<compile_context>
chip_gen: v6e
topology: v6e:2x2x1
jax: 0.10.0
libtpu: 0.0.40
codegen_flags: <defaults>
</compile_context>

<pallas_src>
import functools

import jax
import jax.numpy as jnp
import numpy as np
from jax.experimental import pallas as pl
from jax.experimental.pallas import tpu as pltpu

LANE = 128


def _round_up(v, m):
    return -(-v // m) * m


# ----------------------------------------------------------------------------
# Kernel: one grid step == one tree level.  State (previous level's features
# and child hiddens) is resident in VMEM scratch across grid steps; weights are
# fetched once (constant index_map, single-buffered).
# ----------------------------------------------------------------------------
def tree_kernel(nlev_ref,                                    # SMEM (L,) schedule
                hroot_ref, meta_ref, gx_ref, gh_ref,         # per-level inputs
                wcat_ref, brnn_ref, wog_ref, bout_ref, bg_ref,  # weights (resident)
                hid_ref, feat_ref, child_ref,                # per-level outputs
                xh_scr, feat_scr, child_scr,                 # VMEM-resident state
                *, c, dout, d_p):
    f32 = jnp.float32
    l = pl.program_id(0)
    maxn = xh_scr.shape[0]

    # ---- gather this level's (dx | dh) -------------------------------------
    # level 0: dx = zero_input_with_bias, dh = h_root
    # level>0: dx = parent node_features, dh = parent child_hiddens[slot],
    #          selected from the VMEM-resident previous-level state via one-hot
    #          schedule matmuls (kept f32: one-hot selection, exact).
    @pl.when(l == 0)
    def _():
        xh_scr[:, :d_p] = jnp.zeros((maxn, d_p), f32)
        xh_scr[:, d_p:] = hroot_ref[...]

    @pl.when(l > 0)
    def _():
        xh_scr[:, :d_p] = jnp.dot(gx_ref[0], feat_scr[...],
                                  preferred_element_type=f32)
        xh_scr[:, d_p:] = jnp.dot(gh_ref[0], child_scr[...],
                                  preferred_element_type=f32)

    mm_dtype = wcat_ref.dtype
    meta = meta_ref[0]                       # (MAXN, 128): [disc, rs_0..rs_{C-1}, 0..]
    disc = meta[:, 0:1]
    row = jax.lax.broadcasted_iota(jnp.int32, (maxn, 1), 0)
    active = row < nlev_ref[l]               # schedule table: mask padding rows

    # discount normalisation (division, matching the reference exactly)
    xh = xh_scr[...] / disc

    # fused Elman step: one K=(D_p+H_p) MXU matmul on [x | h] vs [W_ih ; W_hh]
    hid = jnp.tanh(
        jnp.dot(xh.astype(mm_dtype), wcat_ref[...], preferred_element_type=f32)
        + brnn_ref[...])
    hid = jnp.where(active, hid, 0.0)
    hid_ref[0] = hid

    # fused shared-LHS projection: hid @ [W_out | W_g] (256-wide MXU pass)
    fo = jnp.dot(hid.astype(mm_dtype), wog_ref[...], preferred_element_type=f32)
    feat_raw = fo[:, :d_p] + bout_ref[...]   # padded lanes are exactly 0
    gw = fo[:, d_p:]                         # hid @ W_g (bias added after scaling)

    # padding-aware two-pass layer_norm (eps=1e-5, no affine) + ReLU
    inv_d = 1.0 / dout
    mu = jnp.sum(feat_raw, axis=-1, keepdims=True) * inv_d
    diff = feat_raw - mu
    if dout != d_p:                          # static: mask only when padded
        lane = jax.lax.broadcasted_iota(jnp.int32, feat_raw.shape, 1)
        diff = jnp.where(lane < dout, diff, 0.0)
    var = jnp.sum(diff * diff, axis=-1, keepdims=True) * inv_d
    feat = jnp.maximum(diff * jax.lax.rsqrt(var + 1e-5), 0.0)
    feat = jnp.where(active, feat, 0.0)
    feat_scr[...] = feat
    feat_ref[0] = feat

    # GCN over children under the dense-broadcast unpooling approximation:
    # A_c @ broadcast(hid) == rowsum(A_c) * hid, so each child row is a cheap
    # per-node lane scale of the shared hid @ W_g result.
    for cc in range(c):                      # static unroll (C is small)
        ch = meta[:, 1 + cc:2 + cc] * gw + bg_ref[...]
        ch = jnp.where(active, ch, 0.0)
        child_scr[cc * maxn:(cc + 1) * maxn, :] = ch
        child_ref[0, cc] = ch.astype(child_ref.dtype)


# ----------------------------------------------------------------------------
# Level-invariant weight prep (hoisted, done ONCE per forward).
# ----------------------------------------------------------------------------
def prepare_params(w_ih, w_hh, b_rnn, w_out, b_out, w_g, b_g, *,
                   mm_dtype=jnp.bfloat16):
    f32 = jnp.float32
    din, h = w_ih.shape
    dout = w_out.shape[1]
    assert dout == din, "module feeds node_features back as the children's dx"
    d_p = _round_up(din, LANE)
    h_p = _round_up(h, LANE)
    # Zero padding is what makes the padding-aware layer_norm and next-level
    # gather exact — preserve it if pre-padded weights are supplied externally.
    w_cat = jnp.zeros((d_p + h_p, h_p), f32)
    w_cat = w_cat.at[:din, :h].set(w_ih.astype(f32))
    w_cat = w_cat.at[d_p:d_p + h, :h].set(w_hh.astype(f32))
    w_og = jnp.zeros((h_p, d_p + h_p), f32)
    w_og = w_og.at[:h, :dout].set(w_out.astype(f32))
    w_og = w_og.at[:h, d_p:d_p + h].set(w_g.astype(f32))
    return dict(
        w_cat=w_cat.astype(mm_dtype),
        w_og=w_og.astype(mm_dtype),
        b_rnn=jnp.zeros((1, h_p), f32).at[:, :h].set(b_rnn.astype(f32).reshape(1, h)),
        b_out=jnp.zeros((1, d_p), f32).at[:, :dout].set(b_out.astype(f32).reshape(1, dout)),
        b_g=jnp.zeros((1, h_p), f32).at[:, :h].set(b_g.astype(f32).reshape(1, h)),
    )


# ----------------------------------------------------------------------------
# Flatten the host-side tree bookkeeping (dvisit / get_child / batch_disassemble)
# into dense schedule tables consumed by the single pallas_call.
#   levels[0]   = number of roots
#   levels[l>0] = list of (parent_row_in_prev_level, child_slot)
# A gather-matrix row with several ones realises multi-parent accumulation.
# ----------------------------------------------------------------------------
def prepare_schedule(levels, discounts, adjacencies, n_children, max_nodes):
    L = len(levels)
    C = n_children
    assert C + 1 <= LANE
    nlev = np.zeros((L,), np.int32)
    meta = np.zeros((L, max_nodes, LANE), np.float32)
    meta[:, :, 0] = 1.0                                  # discount=1 on padding rows
    gx = np.zeros((L, max_nodes, max_nodes), np.float32)
    gh = np.zeros((L, max_nodes, C * max_nodes), np.float32)
    for l in range(L):
        if l == 0:
            n = int(levels[0])
        else:
            n = len(levels[l])
            for i, (p, s) in enumerate(levels[l]):
                gx[l, i, p] = 1.0
                gh[l, i, s * max_nodes + p] = 1.0
        nlev[l] = n
        meta[l, :n, 0] = np.asarray(discounts[l], np.float32)
        meta[l, :n, 1:1 + C] = np.asarray(jnp.sum(adjacencies[l], axis=-1), np.float32)
    return (jnp.asarray(nlev), jnp.asarray(meta), jnp.asarray(gx), jnp.asarray(gh))


# ----------------------------------------------------------------------------
# Whole-traversal forward: one pallas_call over all levels.
# Returns lane-padded outputs; child_hiddens stays child-major (L, C, MAXN, H_p)
# — no post-kernel transpose (consumers read child-major).
# ----------------------------------------------------------------------------
@functools.partial(jax.jit, static_argnames=("dout", "single_buffer_weights"))
def deconv_tree_forward(nodes_per_level, h_root_p, meta, gx, gh, params, *,
                        dout, single_buffer_weights=True):
    L, maxn, mlanes = meta.shape
    h_p = h_root_p.shape[1]
    d_p = params["b_out"].shape[1]
    k_p = params["w_cat"].shape[0]
    ow = params["w_og"].shape[1]
    c = gh.shape[2] // maxn
    mm_dtype = params["w_cat"].dtype
    child_dtype = jnp.bfloat16 if mm_dtype == jnp.bfloat16 else jnp.float32

    def const_spec(shape):
        # Level-invariant blocks: fetched once; single-buffered to avoid keeping
        # a second VMEM copy (matters on v7x's 64 MiB VMEM for real weight sizes).
        if single_buffer_weights:
            return pl.BlockSpec(shape, lambda l, nl: (0, 0),
                                pipeline_mode=pl.Buffered(1))
        return pl.BlockSpec(shape, lambda l, nl: (0, 0))

    grid_spec = pltpu.PrefetchScalarGridSpec(
        num_scalar_prefetch=1,                               # nodes-per-level table
        grid=(L,),
        in_specs=[
            const_spec((maxn, h_p)),                                     # h_root
            pl.BlockSpec((1, maxn, mlanes), lambda l, nl: (l, 0, 0)),    # [disc|rowsum]
            pl.BlockSpec((1, maxn, gx.shape[2]), lambda l, nl: (l, 0, 0)),  # x gather
            pl.BlockSpec((1, maxn, gh.shape[2]), lambda l, nl: (l, 0, 0)),  # h gather
            const_spec((k_p, h_p)),                                      # [W_ih;W_hh]
            const_spec((1, h_p)),                                        # b_rnn
            const_spec((h_p, ow)),                                       # [W_out|W_g]
            const_spec((1, d_p)),                                        # b_out
            const_spec((1, h_p)),                                        # b_g
        ],
        out_specs=(
            pl.BlockSpec((1, maxn, h_p), lambda l, nl: (l, 0, 0)),       # hiddens
            pl.BlockSpec((1, maxn, d_p), lambda l, nl: (l, 0, 0)),       # node_features
            pl.BlockSpec((1, c, maxn, h_p), lambda l, nl: (l, 0, 0, 0)), # child hiddens
        ),
        scratch_shapes=[
            pltpu.VMEM((maxn, k_p), jnp.float32),       # [x | h] for this level
            pltpu.VMEM((maxn, d_p), jnp.float32),       # resident node_features
            pltpu.VMEM((c * maxn, h_p), jnp.float32),   # resident child hiddens
        ],
    )

    kernel = functools.partial(tree_kernel, c=c, dout=dout, d_p=d_p)

    return pl.pallas_call(
        kernel,
        grid_spec=grid_spec,
        out_shape=(
            jax.ShapeDtypeStruct((L, maxn, h_p), jnp.float32),
            jax.ShapeDtypeStruct((L, maxn, d_p), jnp.float32),
            jax.ShapeDtypeStruct((L, c, maxn, h_p), child_dtype),
        ),
        compiler_params=pltpu.CompilerParams(
            dimension_semantics=("arbitrary",),          # levels are sequential
            vmem_limit_bytes=32 * 1024 * 1024),
    )(nodes_per_level, h_root_p, meta, gx, gh,
      params["w_cat"], params["b_rnn"], params["w_og"],
      params["b_out"], params["b_g"])


# ----------------------------------------------------------------------------
# Pure-JAX reference (exact gather; mm_dtype emulates MXU operand rounding so
# the bf16 path can be checked tightly; mm_dtype=f32 == exact module math).
# ----------------------------------------------------------------------------
def ref_tree_forward(h_root, levels, discounts, adjacencies,
                     w_ih, w_hh, b_rnn, w_out, b_out, w_g, b_g,
                     mm_dtype=jnp.float32):
    f32 = jnp.float32
    hp = jax.lax.Precision.HIGHEST
    cast = lambda a: a.astype(mm_dtype).astype(f32)
    x = jnp.zeros((int(levels[0]), w_ih.shape[0]), f32)     # zero_input_with_bias
    h = h_root.astype(f32)
    out = []
    feat_prev = child_prev = None
    for l in range(len(levels)):
        if l > 0:
            parents = jnp.asarray([p for p, _ in levels[l]], jnp.int32)
            slots = jnp.asarray([s for _, s in levels[l]], jnp.int32)
            x = feat_prev[parents]
            h = child_prev[parents, slots]
        disc = discounts[l][:, None].astype(f32)
        xd, hd = x / disc, h / disc
        hid = jnp.tanh(jnp.dot(cast(xd), cast(w_ih), precision=hp)
                       + jnp.dot(cast(hd), cast(w_hh), precision=hp) + b_rnn)
        feat_raw = jnp.dot(cast(hid), cast(w_out), precision=hp) + b_out
        mu = jnp.mean(feat_raw, axis=-1, keepdims=True)
        var = jnp.mean((feat_raw - mu) ** 2, axis=-1, keepdims=True)
        feat = jnp.maximum((feat_raw - mu) * jax.lax.rsqrt(var + 1e-5), 0.0)
        rs = jnp.sum(adjacencies[l].astype(f32), axis=-1)   # rowsum(A_c): (n, C)
        gw = jnp.dot(cast(hid), cast(w_g), precision=hp)
        # == (A_c @ dense-broadcast-unpooled(hid)) @ W_g + b_g
        child = rs[:, :, None] * gw[:, None, :] + b_g
        out.append((hid, feat, child))
        feat_prev, child_prev = feat, child
    return out


# ----------------------------------------------------------------------------
if __name__ == "__main__":
    # module hyper-parameters (small, consistent with __init__ shapes)
    input_dim, type_count = 4, 2
    DIN = input_dim + type_count          # input_dim_with_bias
    H = 32                                # hidden_dim
    C = 4                                 # children per node (node_count)
    N_TREES = 2                           # batch of trees (roots at level 0)
    MAXN = 8                              # max nodes per level (padding rows masked)

    # tree schedule: BFS wavefronts of the DFS recursion (per-node values are
    # traversal-order independent; DFS ordering of `outputs` is host bookkeeping)
    levels = [
        N_TREES,
        [(0, 0), (0, 1), (0, 2), (1, 0), (1, 1), (1, 3)],
        [(0, 0), (0, 3), (1, 1), (2, 2), (3, 0), (4, 1), (5, 3), (5, 0)],
    ]
    L = len(levels)
    counts = [levels[0]] + [len(lv) for lv in levels[1:]]

    ks = jax.random.split(jax.random.PRNGKey(0), 8 + 2 * L)
    w_ih = jax.random.normal(ks[0], (DIN, H), jnp.float32) * 0.1
    w_hh = jax.random.normal(ks[1], (H, H), jnp.float32) * 0.1
    b_rnn = jax.random.normal(ks[2], (1, H), jnp.float32) * 0.1    # b_ih + b_hh
    w_out = jax.random.normal(ks[3], (H, DIN), jnp.float32) * 0.1
    b_out = jax.random.normal(ks[4], (1, DIN), jnp.float32) * 0.1
    w_g = jax.random.normal(ks[5], (H, H), jnp.float32) * 0.1      # GCN weight
    b_g = jax.random.normal(ks[6], (1, H), jnp.float32) * 0.1
    h_root = jax.random.normal(ks[7], (N_TREES, H), jnp.float32)

    discounts, adjacencies = [], []
    for l in range(L):
        n_l = counts[l]
        discounts.append(
            (1.0 + jax.random.randint(ks[8 + 2 * l], (n_l,), 0, 3)).astype(jnp.float32))
        adjacencies.append(jax.random.uniform(ks[9 + 2 * l], (n_l, C, C), jnp.float32))

    # host-side flattening of the data-dependent tree bookkeeping
    nlev, meta, gx, gh = prepare_schedule(levels, discounts, adjacencies, C, MAXN)
    H_P = _round_up(H, LANE)
    h_root_p = jnp.zeros((MAXN, H_P), jnp.float32).at[:N_TREES, :H].set(h_root)

    def run(mm_dtype, single_buffer):
        params = prepare_params(w_ih, w_hh, b_rnn, w_out, b_out, w_g, b_g,
                                mm_dtype=mm_dtype)
        outs = deconv_tree_forward(nlev, h_root_p, meta, gx, gh, params,
                                   dout=DIN, single_buffer_weights=single_buffer)
        jax.block_until_ready(outs)
        return outs

    try:                                   # preferred: single-buffered resident weights
        outs_bf16 = run(jnp.bfloat16, True)
        sb = True
    except Exception:                      # fallback if pipeline_mode is unsupported
        outs_bf16 = run(jnp.bfloat16, False)
        sb = False
    outs_f32 = run(jnp.float32, sb)        # exact-math debug/parity path

    # TODO(synk): multi_restoration_connector (deconv_out / deconv_type_out) is
    # external data-dependent head logic and is not modelled here.
    # TODO(synk): MaxunpoolReadoutLayer places the parent hidden at tree-indexed
    # child slots; as in the reference it is approximated by a dense broadcast
    # across the C children (rowsum(A_c) folding is exact under that approximation).

    def check(outs, mm_dtype, atol, rtol):
        ref = ref_tree_forward(h_root, levels, discounts, adjacencies,
                               w_ih, w_hh, b_rnn, w_out, b_out, w_g, b_g,
                               mm_dtype=mm_dtype)
        hid_o, feat_o, child_o = outs
        for l in range(L):
            n = counts[l]
            r_hid, r_feat, r_child = ref[l]
            assert jnp.allclose(hid_o[l, :n, :H], r_hid, atol=atol, rtol=rtol)
            assert jnp.allclose(feat_o[l, :n, :DIN], r_feat, atol=atol, rtol=rtol)
            k_child = jnp.transpose(                      # test-harness only; the
                child_o[l, :, :n, :H].astype(jnp.float32), (1, 0, 2))  # kernel output
            assert jnp.allclose(k_child, r_child, atol=atol, rtol=rtol)  # stays child-major

    check(outs_f32, jnp.float32, atol=2e-3, rtol=2e-3)     # exact-math parity
    check(outs_bf16, jnp.bfloat16, atol=1e-2, rtol=1e-2)   # MXU-native bf16 path

    print("KERNEL_OK")
</pallas_src>

<mosaic_0001>
module attributes {stable_mosaic.version = 11 : i64} {
  func.func @tree_kernel(%arg0: i32, %arg1: memref<3xi32, #tpu.memory_space<smem>>, %arg2: memref<8x128xf32, #tpu.memory_space<vmem>>, %arg3: memref<1x8x128xf32, #tpu.memory_space<vmem>>, %arg4: memref<1x8x8xf32, #tpu.memory_space<vmem>>, %arg5: memref<1x8x32xf32, #tpu.memory_space<vmem>>, %arg6: memref<256x128xbf16, #tpu.memory_space<vmem>>, %arg7: memref<1x128xf32, #tpu.memory_space<vmem>>, %arg8: memref<128x256xbf16, #tpu.memory_space<vmem>>, %arg9: memref<1x128xf32, #tpu.memory_space<vmem>>, %arg10: memref<1x128xf32, #tpu.memory_space<vmem>>, %arg11: memref<1x8x128xf32, #tpu.memory_space<vmem>>, %arg12: memref<1x8x128xf32, #tpu.memory_space<vmem>>, %arg13: memref<1x4x8x128xbf16, #tpu.memory_space<vmem>>, %arg14: memref<8x256xf32, #tpu.memory_space<vmem>>, %arg15: memref<8x128xf32, #tpu.memory_space<vmem>>, %arg16: memref<32x128xf32, #tpu.memory_space<vmem>>) attributes {dimension_semantics = [#tpu.dimension_semantics<arbitrary>], iteration_bounds = array<i64: 3>, scalar_prefetch = 1 : i64, scratch_operands = 3 : i64, tpu.core_type = #tpu.core_type<tc>, window_params = [{pipeline_mode = #tpu.pipeline_mode<synchronous>, transform_indices = @transform_0, window_bounds = array<i64: 8, 128>}, {transform_indices = @transform_1, window_bounds = array<i64: 1, 8, 128>}, {transform_indices = @transform_2, window_bounds = array<i64: 1, 8, 8>}, {transform_indices = @transform_3, window_bounds = array<i64: 1, 8, 32>}, {pipeline_mode = #tpu.pipeline_mode<synchronous>, transform_indices = @transform_4, window_bounds = array<i64: 256, 128>}, {pipeline_mode = #tpu.pipeline_mode<synchronous>, transform_indices = @transform_5, window_bounds = array<i64: 1, 128>}, {pipeline_mode = #tpu.pipeline_mode<synchronous>, transform_indices = @transform_6, window_bounds = array<i64: 128, 256>}, {pipeline_mode = #tpu.pipeline_mode<synchronous>, transform_indices = @transform_7, window_bounds = array<i64: 1, 128>}, {pipeline_mode = #tpu.pipeline_mode<synchronous>, transform_indices = @transform_8, window_bounds = array<i64: 1, 128>}, {transform_indices = @transform_9, window_bounds = array<i64: 1, 8, 128>}, {transform_indices = @transform_10, window_bounds = array<i64: 1, 8, 128>}, {transform_indices = @transform_11, window_bounds = array<i64: 1, 4, 8, 128>}]} {
    %c0_i32 = arith.constant 0 : i32
    %0 = arith.cmpi eq, %arg0, %c0_i32 : i32
    %1 = arith.extui %0 : i1 to i32
    %c0_i32_0 = arith.constant 0 : i32
    %2 = arith.cmpi ne, %1, %c0_i32_0 : i32
    scf.if %2 {
      %cst_63 = arith.constant 0.000000e+00 : f32
      %130 = vector.broadcast %cst_63 : f32 to vector<8x128xf32>
      %c0_64 = arith.constant 0 : index
      %c0_65 = arith.constant 0 : index
      %131 = vector.load %arg14[%c0_64, %c0_65] : memref<8x256xf32, #tpu.memory_space<vmem>>, vector<8x128xf32>
      tpu.vector_store %arg14[%c0_64, %c0_65], %130 {strides = array<i32>} : memref<8x256xf32, #tpu.memory_space<vmem>>, vector<8x128xf32>,
      %c0_66 = arith.constant 0 : index
      %c0_67 = arith.constant 0 : index
      %132 = vector.load %arg2[%c0_66, %c0_67] : memref<8x128xf32, #tpu.memory_space<vmem>>, vector<8x128xf32>
      %c0_68 = arith.constant 0 : index
      %c128 = arith.constant 128 : index
      %133 = vector.load %arg14[%c0_68, %c128] : memref<8x256xf32, #tpu.memory_space<vmem>>, vector<8x128xf32>
      tpu.vector_store %arg14[%c0_68, %c128], %132 {strides = array<i32>} : memref<8x256xf32, #tpu.memory_space<vmem>>, vector<8x128xf32>,
    } else {
    }
    %c0_i32_1 = arith.constant 0 : i32
    %3 = arith.cmpi sgt, %arg0, %c0_i32_1 : i32
    %4 = arith.extui %3 : i1 to i32
    %c0_i32_2 = arith.constant 0 : i32
    %5 = arith.cmpi ne, %4, %c0_i32_2 : i32
    scf.if %5 {
      %c0_63 = arith.constant 0 : index
      %c0_64 = arith.constant 0 : index
      %c0_65 = arith.constant 0 : index
      %130 = vector.load %arg4[%c0_63, %c0_64, %c0_65] : memref<1x8x8xf32, #tpu.memory_space<vmem>>, vector<1x8x8xf32>
      %131 = vector.shape_cast %130 : vector<1x8x8xf32> to vector<8x8xf32>
      %c0_66 = arith.constant 0 : index
      %c0_67 = arith.constant 0 : index
      %132 = vector.load %arg15[%c0_66, %c0_67] : memref<8x128xf32, #tpu.memory_space<vmem>>, vector<8x128xf32>
      %cst_68 = arith.constant dense<0.000000e+00> : vector<8x128xf32>
      %133 = tpu.matmul %131, %132, %cst_68 {dimension_numbers = #tpu.dot_dimension_numbers<[1], [0], [0], [1], [0, 0, 1, 1], [], []>} : vector<8x8xf32>, vector<8x128xf32>, vector<8x128xf32> -> vector<8x128xf32>
      %c0_69 = arith.constant 0 : index
      %c0_70 = arith.constant 0 : index
      %134 = vector.load %arg14[%c0_69, %c0_70] : memref<8x256xf32, #tpu.memory_space<vmem>>, vector<8x128xf32>
      tpu.vector_store %arg14[%c0_69, %c0_70], %133 {strides = array<i32>} : memref<8x256xf32, #tpu.memory_space<vmem>>, vector<8x128xf32>,
      %c0_71 = arith.constant 0 : index
      %c0_72 = arith.constant 0 : index
      %c0_73 = arith.constant 0 : index
      %135 = vector.load %arg5[%c0_71, %c0_72, %c0_73] : memref<1x8x32xf32, #tpu.memory_space<vmem>>, vector<1x8x32xf32>
      %136 = vector.shape_cast %135 : vector<1x8x32xf32> to vector<8x32xf32>
      %c0_74 = arith.constant 0 : index
      %c0_75 = arith.constant 0 : index
      %137 = vector.load %arg16[%c0_74, %c0_75] : memref<32x128xf32, #tpu.memory_space<vmem>>, vector<32x128xf32>
      %cst_76 = arith.constant dense<0.000000e+00> : vector<8x128xf32>
      %138 = tpu.matmul %136, %137, %cst_76 {dimension_numbers = #tpu.dot_dimension_numbers<[1], [0], [0], [1], [0, 0, 1, 1], [], []>} : vector<8x32xf32>, vector<32x128xf32>, vector<8x128xf32> -> vector<8x128xf32>
      %c0_77 = arith.constant 0 : index
      %c128 = arith.constant 128 : index
      %139 = vector.load %arg14[%c0_77, %c128] : memref<8x256xf32, #tpu.memory_space<vmem>>, vector<8x128xf32>
      tpu.vector_store %arg14[%c0_77, %c128], %138 {strides = array<i32>} : memref<8x256xf32, #tpu.memory_space<vmem>>, vector<8x128xf32>,
    } else {
    }
    %c0 = arith.constant 0 : index
    %c0_3 = arith.constant 0 : index
    %c0_4 = arith.constant 0 : index
    %6 = vector.load %arg3[%c0, %c0_3, %c0_4] : memref<1x8x128xf32, #tpu.memory_space<vmem>>, vector<1x8x128xf32>
    %7 = vector.shape_cast %6 : vector<1x8x128xf32> to vector<8x128xf32>
    %8 = vector.extract_strided_slice %7 {offsets = [0, 0], sizes = [8, 1], strides = [1, 1]} : vector<8x128xf32> to vector<8x1xf32>
    %9 = tpu.iota {dimensions = array<i32: 0>} : vector<8x1xi32>
    %10 = arith.index_cast %arg0 : i32 to index
    %11 = memref.load %arg1[%10] : memref<3xi32, #tpu.memory_space<smem>>
    %12 = vector.broadcast %11 : i32 to vector<8x1xi32>
    %13 = arith.cmpi slt, %9, %12 : vector<8x1xi32>
    %c0_5 = arith.constant 0 : index
    %c0_6 = arith.constant 0 : index
    %14 = vector.load %arg14[%c0_5, %c0_6] : memref<8x256xf32, #tpu.memory_space<vmem>>, vector<8x256xf32>
    %15 = vector.broadcast %8 : vector<8x1xf32> to vector<8x256xf32>
    %16 = arith.divf %14, %15 : vector<8x256xf32>
    %17 = arith.truncf %16 : vector<8x256xf32> to vector<8x256xbf16>
    %c0_7 = arith.constant 0 : index
    %c0_8 = arith.constant 0 : index
    %18 = vector.load %arg6[%c0_7, %c0_8] : memref<256x128xbf16, #tpu.memory_space<vmem>>, vector<256x128xbf16>
    %cst = arith.constant dense<0.000000e+00> : vector<8x128xf32>
    %19 = tpu.matmul %17, %18, %cst {dimension_numbers = #tpu.dot_dimension_numbers<[1], [0], [0], [1], [0, 0, 1, 1], [], []>} : vector<8x256xbf16>, vector<256x128xbf16>, vector<8x128xf32> -> vector<8x128xf32>
    %c0_9 = arith.constant 0 : index
    %c0_10 = arith.constant 0 : index
    %20 = vector.load %arg7[%c0_9, %c0_10] : memref<1x128xf32, #tpu.memory_space<vmem>>, vector<1x128xf32>
    %21 = vector.broadcast %20 : vector<1x128xf32> to vector<8x128xf32>
    %22 = arith.addf %19, %21 : vector<8x128xf32>
    %23 = math.tanh %22 : vector<8x128xf32>
    %cst_11 = arith.constant 0.000000e+00 : f32
    %24 = vector.shape_cast %13 : vector<8x1xi1> to vector<8x1xi1>
    %25 = vector.broadcast %24 : vector<8x1xi1> to vector<8x128xi1>
    %26 = vector.broadcast %cst_11 : f32 to vector<8x128xf32>
    %27 = arith.select %25, %23, %26 : vector<8x128xi1>, vector<8x128xf32>
    %c0_12 = arith.constant 0 : index
    %c0_13 = arith.constant 0 : index
    %c0_14 = arith.constant 0 : index
    %28 = vector.load %arg11[%c0_12, %c0_13, %c0_14] : memref<1x8x128xf32, #tpu.memory_space<vmem>>, vector<1x8x128xf32>
    %29 = vector.shape_cast %28 : vector<1x8x128xf32> to vector<8x128xf32>
    %30 = vector.shape_cast %27 : vector<8x128xf32> to vector<1x8x128xf32>
    tpu.vector_store %arg11[%c0_12, %c0_13, %c0_14], %30 {strides = array<i32>} : memref<1x8x128xf32, #tpu.memory_space<vmem>>, vector<1x8x128xf32>,
    %31 = arith.truncf %27 : vector<8x128xf32> to vector<8x128xbf16>
    %c0_15 = arith.constant 0 : index
    %c0_16 = arith.constant 0 : index
    %32 = vector.load %arg8[%c0_15, %c0_16] : memref<128x256xbf16, #tpu.memory_space<vmem>>, vector<128x256xbf16>
    %cst_17 = arith.constant dense<0.000000e+00> : vector<8x256xf32>
    %33 = tpu.matmul %31, %32, %cst_17 {dimension_numbers = #tpu.dot_dimension_numbers<[1], [0], [0], [1], [0, 0, 1, 1], [], []>} : vector<8x128xbf16>, vector<128x256xbf16>, vector<8x256xf32> -> vector<8x256xf32>
    %34 = vector.extract_strided_slice %33 {offsets = [0, 0], sizes = [8, 128], strides = [1, 1]} : vector<8x256xf32> to vector<8x128xf32>
    %c0_18 = arith.constant 0 : index
    %c0_19 = arith.constant 0 : index
    %35 = vector.load %arg9[%c0_18, %c0_19] : memref<1x128xf32, #tpu.memory_space<vmem>>, vector<1x128xf32>
    %36 = vector.broadcast %35 : vector<1x128xf32> to vector<8x128xf32>
    %37 = arith.addf %34, %36 : vector<8x128xf32>
    %38 = vector.extract_strided_slice %33 {offsets = [0, 128], sizes = [8, 128], strides = [1, 1]} : vector<8x256xf32> to vector<8x128xf32>
    %cst_20 = arith.constant dense<0.000000e+00> : vector<8xf32>
    %39 = vector.multi_reduction <add>, %37, %cst_20 [1] : vector<8x128xf32> to vector<8xf32>
    %40 = vector.shape_cast %39 : vector<8xf32> to vector<8x1xf32>
    %cst_21 = arith.constant 0.166666672 : f32
    %41 = vector.broadcast %cst_21 : f32 to vector<8x1xf32>
    %42 = arith.mulf %40, %41 : vector<8x1xf32>
    %43 = vector.broadcast %42 : vector<8x1xf32> to vector<8x128xf32>
    %44 = arith.subf %37, %43 : vector<8x128xf32>
    %45 = tpu.iota {dimensions = array<i32: 1>} : vector<8x128xi32>
    %c6_i32 = arith.constant 6 : i32
    %46 = vector.broadcast %c6_i32 : i32 to vector<8x128xi32>
    %47 = arith.cmpi slt, %45, %46 : vector<8x128xi32>
    %cst_22 = arith.constant 0.000000e+00 : f32
    %48 = vector.broadcast %cst_22 : f32 to vector<8x128xf32>
    %49 = arith.select %47, %44, %48 : vector<8x128xi1>, vector<8x128xf32>
    %50 = arith.mulf %49, %49 : vector<8x128xf32>
    %cst_23 = arith.constant dense<0.000000e+00> : vector<8xf32>
    %51 = vector.multi_reduction <add>, %50, %cst_23 [1] : vector<8x128xf32> to vector<8xf32>
    %52 = vector.shape_cast %51 : vector<8xf32> to vector<8x1xf32>
    %cst_24 = arith.constant 0.166666672 : f32
    %53 = vector.broadcast %cst_24 : f32 to vector<8x1xf32>
    %54 = arith.mulf %52, %53 : vector<8x1xf32>
    %cst_25 = arith.constant 9.99999974E-6 : f32
    %55 = vector.broadcast %cst_25 : f32 to vector<8x1xf32>
    %56 = arith.addf %54, %55 : vector<8x1xf32>
    %57 = math.rsqrt %56 : vector<8x1xf32>
    %58 = vector.broadcast %57 : vector<8x1xf32> to vector<8x128xf32>
    %59 = arith.mulf %49, %58 : vector<8x128xf32>
    %cst_26 = arith.constant 0.000000e+00 : f32
    %60 = vector.broadcast %cst_26 : f32 to vector<8x128xf32>
    %61 = arith.maximumf %59, %60 : vector<8x128xf32>
    %cst_27 = arith.constant 0.000000e+00 : f32
    %62 = vector.shape_cast %13 : vector<8x1xi1> to vector<8x1xi1>
    %63 = vector.broadcast %62 : vector<8x1xi1> to vector<8x128xi1>
    %64 = vector.broadcast %cst_27 : f32 to vector<8x128xf32>
    %65 = arith.select %63, %61, %64 : vector<8x128xi1>, vector<8x128xf32>
    %c0_28 = arith.constant 0 : index
    %c0_29 = arith.constant 0 : index
    %66 = vector.load %arg15[%c0_28, %c0_29] : memref<8x128xf32, #tpu.memory_space<vmem>>, vector<8x128xf32>
    tpu.vector_store %arg15[%c0_28, %c0_29], %65 {strides = array<i32>} : memref<8x128xf32, #tpu.memory_space<vmem>>, vector<8x128xf32>,
    %c0_30 = arith.constant 0 : index
    %c0_31 = arith.constant 0 : index
    %c0_32 = arith.constant 0 : index
    %67 = vector.load %arg12[%c0_30, %c0_31, %c0_32] : memref<1x8x128xf32, #tpu.memory_space<vmem>>, vector<1x8x128xf32>
    %68 = vector.shape_cast %67 : vector<1x8x128xf32> to vector<8x128xf32>
    %69 = vector.shape_cast %65 : vector<8x128xf32> to vector<1x8x128xf32>
    tpu.vector_store %arg12[%c0_30, %c0_31, %c0_32], %69 {strides = array<i32>} : memref<1x8x128xf32, #tpu.memory_space<vmem>>, vector<1x8x128xf32>,
    %70 = vector.extract_strided_slice %7 {offsets = [0, 1], sizes = [8, 1], strides = [1, 1]} : vector<8x128xf32> to vector<8x1xf32>
    %71 = vector.broadcast %70 : vector<8x1xf32> to vector<8x128xf32>
    %72 = arith.mulf %71, %38 : vector<8x128xf32>
    %c0_33 = arith.constant 0 : index
    %c0_34 = arith.constant 0 : index
    %73 = vector.load %arg10[%c0_33, %c0_34] : memref<1x128xf32, #tpu.memory_space<vmem>>, vector<1x128xf32>
    %74 = vector.broadcast %73 : vector<1x128xf32> to vector<8x128xf32>
    %75 = arith.addf %72, %74 : vector<8x128xf32>
    %cst_35 = arith.constant 0.000000e+00 : f32
    %76 = vector.shape_cast %13 : vector<8x1xi1> to vector<8x1xi1>
    %77 = vector.broadcast %76 : vector<8x1xi1> to vector<8x128xi1>
    %78 = vector.broadcast %cst_35 : f32 to vector<8x128xf32>
    %79 = arith.select %77, %75, %78 : vector<8x128xi1>, vector<8x128xf32>
    %c0_36 = arith.constant 0 : index
    %c0_37 = arith.constant 0 : index
    %80 = vector.load %arg16[%c0_36, %c0_37] : memref<32x128xf32, #tpu.memory_space<vmem>>, vector<8x128xf32>
    tpu.vector_store %arg16[%c0_36, %c0_37], %79 {strides = array<i32>} : memref<32x128xf32, #tpu.memory_space<vmem>>, vector<8x128xf32>,
    %81 = arith.truncf %79 : vector<8x128xf32> to vector<8x128xbf16>
    %c0_38 = arith.constant 0 : index
    %c0_39 = arith.constant 0 : index
    %c0_40 = arith.constant 0 : index
    %c0_41 = arith.constant 0 : index
    %82 = vector.load %arg13[%c0_38, %c0_39, %c0_40, %c0_41] : memref<1x4x8x128xbf16, #tpu.memory_space<vmem>>, vector<1x1x8x128xbf16>
    %83 = vector.shape_cast %82 : vector<1x1x8x128xbf16> to vector<8x128xbf16>
    %84 = vector.shape_cast %81 : vector<8x128xbf16> to vector<1x1x8x128xbf16>
    tpu.vector_store %arg13[%c0_38, %c0_39, %c0_40, %c0_41], %84 {strides = array<i32>} : memref<1x4x8x128xbf16, #tpu.memory_space<vmem>>, vector<1x1x8x128xbf16>,
    %85 = vector.extract_strided_slice %7 {offsets = [0, 2], sizes = [8, 1], strides = [1, 1]} : vector<8x128xf32> to vector<8x1xf32>
    %86 = vector.broadcast %85 : vector<8x1xf32> to vector<8x128xf32>
    %87 = arith.mulf %86, %38 : vector<8x128xf32>
    %c0_42 = arith.constant 0 : index
    %c0_43 = arith.constant 0 : index
    %88 = vector.load %arg10[%c0_42, %c0_43] : memref<1x128xf32, #tpu.memory_space<vmem>>, vector<1x128xf32>
    %89 = vector.broadcast %88 : vector<1x128xf32> to vector<8x128xf32>
    %90 = arith.addf %87, %89 : vector<8x128xf32>
    %cst_44 = arith.constant 0.000000e+00 : f32
    %91 = vector.shape_cast %13 : vector<8x1xi1> to vector<8x1xi1>
    %92 = vector.broadcast %91 : vector<8x1xi1> to vector<8x128xi1>
    %93 = vector.broadcast %cst_44 : f32 to vector<8x128xf32>
    %94 = arith.select %92, %90, %93 : vector<8x128xi1>, vector<8x128xf32>
    %c8 = arith.constant 8 : index
    %c0_45 = arith.constant 0 : index
    %95 = vector.load %arg16[%c8, %c0_45] : memref<32x128xf32, #tpu.memory_space<vmem>>, vector<8x128xf32>
    tpu.vector_store %arg16[%c8, %c0_45], %94 {strides = array<i32>} : memref<32x128xf32, #tpu.memory_space<vmem>>, vector<8x128xf32>,
    %96 = arith.truncf %94 : vector<8x128xf32> to vector<8x128xbf16>
    %c0_46 = arith.constant 0 : index
    %c1 = arith.constant 1 : index
    %c0_47 = arith.constant 0 : index
    %c0_48 = arith.constant 0 : index
    %97 = vector.load %arg13[%c0_46, %c1, %c0_47, %c0_48] : memref<1x4x8x128xbf16, #tpu.memory_space<vmem>>, vector<1x1x8x128xbf16>
    %98 = vector.shape_cast %97 : vector<1x1x8x128xbf16> to vector<8x128xbf16>
    %99 = vector.shape_cast %96 : vector<8x128xbf16> to vector<1x1x8x128xbf16>
    tpu.vector_store %arg13[%c0_46, %c1, %c0_47, %c0_48], %99 {strides = array<i32>} : memref<1x4x8x128xbf16, #tpu.memory_space<vmem>>, vector<1x1x8x128xbf16>,
    %100 = vector.extract_strided_slice %7 {offsets = [0, 3], sizes = [8, 1], strides = [1, 1]} : vector<8x128xf32> to vector<8x1xf32>
    %101 = vector.broadcast %100 : vector<8x1xf32> to vector<8x128xf32>
    %102 = arith.mulf %101, %38 : vector<8x128xf32>
    %c0_49 = arith.constant 0 : index
    %c0_50 = arith.constant 0 : index
    %103 = vector.load %arg10[%c0_49, %c0_50] : memref<1x128xf32, #tpu.memory_space<vmem>>, vector<1x128xf32>
    %104 = vector.broadcast %103 : vector<1x128xf32> to vector<8x128xf32>
    %105 = arith.addf %102, %104 : vector<8x128xf32>
    %cst_51 = arith.constant 0.000000e+00 : f32
    %106 = vector.shape_cast %13 : vector<8x1xi1> to vector<8x1xi1>
    %107 = vector.broadcast %106 : vector<8x1xi1> to vector<8x128xi1>
    %108 = vector.broadcast %cst_51 : f32 to vector<8x128xf32>
    %109 = arith.select %107, %105, %108 : vector<8x128xi1>, vector<8x128xf32>
    %c16 = arith.constant 16 : index
    %c0_52 = arith.constant 0 : index
    %110 = vector.load %arg16[%c16, %c0_52] : memref<32x128xf32, #tpu.memory_space<vmem>>, vector<8x128xf32>
    tpu.vector_store %arg16[%c16, %c0_52], %109 {strides = array<i32>} : memref<32x128xf32, #tpu.memory_space<vmem>>, vector<8x128xf32>,
    %111 = arith.truncf %109 : vector<8x128xf32> to vector<8x128xbf16>
    %c0_53 = arith.constant 0 : index
    %c2 = arith.constant 2 : index
    %c0_54 = arith.constant 0 : index
    %c0_55 = arith.constant 0 : index
    %112 = vector.load %arg13[%c0_53, %c2, %c0_54, %c0_55] : memref<1x4x8x128xbf16, #tpu.memory_space<vmem>>, vector<1x1x8x128xbf16>
    %113 = vector.shape_cast %112 : vector<1x1x8x128xbf16> to vector<8x128xbf16>
    %114 = vector.shape_cast %111 : vector<8x128xbf16> to vector<1x1x8x128xbf16>
    tpu.vector_store %arg13[%c0_53, %c2, %c0_54, %c0_55], %114 {strides = array<i32>} : memref<1x4x8x128xbf16, #tpu.memory_space<vmem>>, vector<1x1x8x128xbf16>,
    %115 = vector.extract_strided_slice %7 {offsets = [0, 4], sizes = [8, 1], strides = [1, 1]} : vector<8x128xf32> to vector<8x1xf32>
    %116 = vector.broadcast %115 : vector<8x1xf32> to vector<8x128xf32>
    %117 = arith.mulf %116, %38 : vector<8x128xf32>
    %c0_56 = arith.constant 0 : index
    %c0_57 = arith.constant 0 : index
    %118 = vector.load %arg10[%c0_56, %c0_57] : memref<1x128xf32, #tpu.memory_space<vmem>>, vector<1x128xf32>
    %119 = vector.broadcast %118 : vector<1x128xf32> to vector<8x128xf32>
    %120 = arith.addf %117, %119 : vector<8x128xf32>
    %cst_58 = arith.constant 0.000000e+00 : f32
    %121 = vector.shape_cast %13 : vector<8x1xi1> to vector<8x1xi1>
    %122 = vector.broadcast %121 : vector<8x1xi1> to vector<8x128xi1>
    %123 = vector.broadcast %cst_58 : f32 to vector<8x128xf32>
    %124 = arith.select %122, %120, %123 : vector<8x128xi1>, vector<8x128xf32>
    %c24 = arith.constant 24 : index
    %c0_59 = arith.constant 0 : index
    %125 = vector.load %arg16[%c24, %c0_59] : memref<32x128xf32, #tpu.memory_space<vmem>>, vector<8x128xf32>
    tpu.vector_store %arg16[%c24, %c0_59], %124 {strides = array<i32>} : memref<32x128xf32, #tpu.memory_space<vmem>>, vector<8x128xf32>,
    %126 = arith.truncf %124 : vector<8x128xf32> to vector<8x128xbf16>
    %c0_60 = arith.constant 0 : index
    %c3 = arith.constant 3 : index
    %c0_61 = arith.constant 0 : index
    %c0_62 = arith.constant 0 : index
    %127 = vector.load %arg13[%c0_60, %c3, %c0_61, %c0_62] : memref<1x4x8x128xbf16, #tpu.memory_space<vmem>>, vector<1x1x8x128xbf16>
    %128 = vector.shape_cast %127 : vector<1x1x8x128xbf16> to vector<8x128xbf16>
    %129 = vector.shape_cast %126 : vector<8x128xbf16> to vector<1x1x8x128xbf16>
    tpu.vector_store %arg13[%c0_60, %c3, %c0_61, %c0_62], %129 {strides = array<i32>} : memref<1x4x8x128xbf16, #tpu.memory_space<vmem>>, vector<1x1x8x128xbf16>,
    return
  }
  func.func @transform_0(%arg0: i32, %arg1: memref<3xi32, #tpu.memory_space<smem>>) -> (i32, i32) {
    %c0_i32 = arith.constant 0 : i32
    %c0_i32_0 = arith.constant 0 : i32
    %c0_i32_1 = arith.constant 0 : i32
    return %c0_i32, %c0_i32_0 : i32, i32
  }
  func.func @transform_1(%arg0: i32, %arg1: memref<3xi32, #tpu.memory_space<smem>>) -> (i32, i32, i32) {
    %c0_i32 = arith.constant 0 : i32
    %c0_i32_0 = arith.constant 0 : i32
    %c0_i32_1 = arith.constant 0 : i32
    return %arg0, %c0_i32, %c0_i32_0 : i32, i32, i32
  }
  func.func @transform_2(%arg0: i32, %arg1: memref<3xi32, #tpu.memory_space<smem>>) -> (i32, i32, i32) {
    %c0_i32 = arith.constant 0 : i32
    %c0_i32_0 = arith.constant 0 : i32
    %c0_i32_1 = arith.constant 0 : i32
    return %arg0, %c0_i32, %c0_i32_0 : i32, i32, i32
  }
  func.func @transform_3(%arg0: i32, %arg1: memref<3xi32, #tpu.memory_space<smem>>) -> (i32, i32, i32) {
    %c0_i32 = arith.constant 0 : i32
    %c0_i32_0 = arith.constant 0 : i32
    %c0_i32_1 = arith.constant 0 : i32
    return %arg0, %c0_i32, %c0_i32_0 : i32, i32, i32
  }
  func.func @transform_4(%arg0: i32, %arg1: memref<3xi32, #tpu.memory_space<smem>>) -> (i32, i32) {
    %c0_i32 = arith.constant 0 : i32
    %c0_i32_0 = arith.constant 0 : i32
    %c0_i32_1 = arith.constant 0 : i32
    return %c0_i32, %c0_i32_0 : i32, i32
  }
  func.func @transform_5(%arg0: i32, %arg1: memref<3xi32, #tpu.memory_space<smem>>) -> (i32, i32) {
    %c0_i32 = arith.constant 0 : i32
    %c0_i32_0 = arith.constant 0 : i32
    %c0_i32_1 = arith.constant 0 : i32
    return %c0_i32, %c0_i32_0 : i32, i32
  }
  func.func @transform_6(%arg0: i32, %arg1: memref<3xi32, #tpu.memory_space<smem>>) -> (i32, i32) {
    %c0_i32 = arith.constant 0 : i32
    %c0_i32_0 = arith.constant 0 : i32
    %c0_i32_1 = arith.constant 0 : i32
    return %c0_i32, %c0_i32_0 : i32, i32
  }
  func.func @transform_7(%arg0: i32, %arg1: memref<3xi32, #tpu.memory_space<smem>>) -> (i32, i32) {
    %c0_i32 = arith.constant 0 : i32
    %c0_i32_0 = arith.constant 0 : i32
    %c0_i32_1 = arith.constant 0 : i32
    return %c0_i32, %c0_i32_0 : i32, i32
  }
  func.func @transform_8(%arg0: i32, %arg1: memref<3xi32, #tpu.memory_space<smem>>) -> (i32, i32) {
    %c0_i32 = arith.constant 0 : i32
    %c0_i32_0 = arith.constant 0 : i32
    %c0_i32_1 = arith.constant 0 : i32
    return %c0_i32, %c0_i32_0 : i32, i32
  }
  func.func @transform_9(%arg0: i32, %arg1: memref<3xi32, #tpu.memory_space<smem>>) -> (i32, i32, i32) {
    %c0_i32 = arith.constant 0 : i32
    %c0_i32_0 = arith.constant 0 : i32
    %c0_i32_1 = arith.constant 0 : i32
    return %arg0, %c0_i32, %c0_i32_0 : i32, i32, i32
  }
  func.func @transform_10(%arg0: i32, %arg1: memref<3xi32, #tpu.memory_space<smem>>) -> (i32, i32, i32) {
    %c0_i32 = arith.constant 0 : i32
    %c0_i32_0 = arith.constant 0 : i32
    %c0_i32_1 = arith.constant 0 : i32
    return %arg0, %c0_i32, %c0_i32_0 : i32, i32, i32
  }
  func.func @transform_11(%arg0: i32, %arg1: memref<3xi32, #tpu.memory_space<smem>>) -> (i32, i32, i32, i32) {
    %c0_i32 = arith.constant 0 : i32
    %c0_i32_0 = arith.constant 0 : i32
    %c0_i32_1 = arith.constant 0 : i32
    %c0_i32_2 = arith.constant 0 : i32
    return %arg0, %c0_i32, %c0_i32_0, %c0_i32_1 : i32, i32, i32, i32
  }
}

module attributes {stable_mosaic.version = 11 : i64} {
  func.func @tree_kernel(%arg0: i32, %arg1: memref<3xi32, #tpu.memory_space<smem>>, %arg2: memref<8x128xf32, #tpu.memory_space<vmem>>, %arg3: memref<1x8x128xf32, #tpu.memory_space<vmem>>, %arg4: memref<1x8x8xf32, #tpu.memory_space<vmem>>, %arg5: memref<1x8x32xf32, #tpu.memory_space<vmem>>, %arg6: memref<256x128xbf16, #tpu.memory_space<vmem>>, %arg7: memref<1x128xf32, #tpu.memory_space<vmem>>, %arg8: memref<128x256xbf16, #tpu.memory_space<vmem>>, %arg9: memref<1x128xf32, #tpu.memory_space<vmem>>, %arg10: memref<1x128xf32, #tpu.memory_space<vmem>>, %arg11: memref<1x8x128xf32, #tpu.memory_space<vmem>>, %arg12: memref<1x8x128xf32, #tpu.memory_space<vmem>>, %arg13: memref<1x4x8x128xbf16, #tpu.memory_space<vmem>>, %arg14: memref<8x256xf32, #tpu.memory_space<vmem>>, %arg15: memref<8x128xf32, #tpu.memory_space<vmem>>, %arg16: memref<32x128xf32, #tpu.memory_space<vmem>>) attributes {dimension_semantics = [#tpu.dimension_semantics<arbitrary>], iteration_bounds = array<i64: 3>, scalar_prefetch = 1 : i64, scratch_operands = 3 : i64, tpu.core_type = #tpu.core_type<tc>, window_params = [{pipeline_mode = #tpu.pipeline_mode<synchronous>, transform_indices = @transform_0, window_bounds = array<i64: 8, 128>}, {transform_indices = @transform_1, window_bounds = array<i64: 1, 8, 128>}, {transform_indices = @transform_2, window_bounds = array<i64: 1, 8, 8>}, {transform_indices = @transform_3, window_bounds = array<i64: 1, 8, 32>}, {pipeline_mode = #tpu.pipeline_mode<synchronous>, transform_indices = @transform_4, window_bounds = array<i64: 256, 128>}, {pipeline_mode = #tpu.pipeline_mode<synchronous>, transform_indices = @transform_5, window_bounds = array<i64: 1, 128>}, {pipeline_mode = #tpu.pipeline_mode<synchronous>, transform_indices = @transform_6, window_bounds = array<i64: 128, 256>}, {pipeline_mode = #tpu.pipeline_mode<synchronous>, transform_indices = @transform_7, window_bounds = array<i64: 1, 128>}, {pipeline_mode = #tpu.pipeline_mode<synchronous>, transform_indices = @transform_8, window_bounds = array<i64: 1, 128>}, {transform_indices = @transform_9, window_bounds = array<i64: 1, 8, 128>}, {transform_indices = @transform_10, window_bounds = array<i64: 1, 8, 128>}, {transform_indices = @transform_11, window_bounds = array<i64: 1, 4, 8, 128>}]} {
    %c0_i32 = arith.constant 0 : i32
    %0 = arith.cmpi eq, %arg0, %c0_i32 : i32
    %1 = arith.extui %0 : i1 to i32
    %c0_i32_0 = arith.constant 0 : i32
    %2 = arith.cmpi ne, %1, %c0_i32_0 : i32
    scf.if %2 {
      %cst_63 = arith.constant 0.000000e+00 : f32
      %130 = vector.broadcast %cst_63 : f32 to vector<8x128xf32>
      %c0_64 = arith.constant 0 : index
      %c0_65 = arith.constant 0 : index
      %131 = vector.load %arg14[%c0_64, %c0_65] : memref<8x256xf32, #tpu.memory_space<vmem>>, vector<8x128xf32>
      tpu.vector_store %arg14[%c0_64, %c0_65], %130 {strides = array<i32>} : memref<8x256xf32, #tpu.memory_space<vmem>>, vector<8x128xf32>,
      %c0_66 = arith.constant 0 : index
      %c0_67 = arith.constant 0 : index
      %132 = vector.load %arg2[%c0_66, %c0_67] : memref<8x128xf32, #tpu.memory_space<vmem>>, vector<8x128xf32>
      %c0_68 = arith.constant 0 : index
      %c128 = arith.constant 128 : index
      %133 = vector.load %arg14[%c0_68, %c128] : memref<8x256xf32, #tpu.memory_space<vmem>>, vector<8x128xf32>
      tpu.vector_store %arg14[%c0_68, %c128], %132 {strides = array<i32>} : memref<8x256xf32, #tpu.memory_space<vmem>>, vector<8x128xf32>,
    } else {
    }
    %c0_i32_1 = arith.constant 0 : i32
    %3 = arith.cmpi sgt, %arg0, %c0_i32_1 : i32
    %4 = arith.extui %3 : i1 to i32
    %c0_i32_2 = arith.constant 0 : i32
    %5 = arith.cmpi ne, %4, %c0_i32_2 : i32
    scf.if %5 {
      %c0_63 = arith.constant 0 : index
      %c0_64 = arith.constant 0 : index
      %c0_65 = arith.constant 0 : index
      %130 = vector.load %arg4[%c0_63, %c0_64, %c0_65] : memref<1x8x8xf32, #tpu.memory_space<vmem>>, vector<1x8x8xf32>
      %131 = vector.shape_cast %130 : vector<1x8x8xf32> to vector<8x8xf32>
      %c0_66 = arith.constant 0 : index
      %c0_67 = arith.constant 0 : index
      %132 = vector.load %arg15[%c0_66, %c0_67] : memref<8x128xf32, #tpu.memory_space<vmem>>, vector<8x128xf32>
      %cst_68 = arith.constant dense<0.000000e+00> : vector<8x128xf32>
      %133 = tpu.matmul %131, %132, %cst_68 {dimension_numbers = #tpu.dot_dimension_numbers<[1], [0], [0], [1], [0, 0, 1, 1], [], []>} : vector<8x8xf32>, vector<8x128xf32>, vector<8x128xf32> -> vector<8x128xf32>
      %c0_69 = arith.constant 0 : index
      %c0_70 = arith.constant 0 : index
      %134 = vector.load %arg14[%c0_69, %c0_70] : memref<8x256xf32, #tpu.memory_space<vmem>>, vector<8x128xf32>
      tpu.vector_store %arg14[%c0_69, %c0_70], %133 {strides = array<i32>} : memref<8x256xf32, #tpu.memory_space<vmem>>, vector<8x128xf32>,
      %c0_71 = arith.constant 0 : index
      %c0_72 = arith.constant 0 : index
      %c0_73 = arith.constant 0 : index
      %135 = vector.load %arg5[%c0_71, %c0_72, %c0_73] : memref<1x8x32xf32, #tpu.memory_space<vmem>>, vector<1x8x32xf32>
      %136 = vector.shape_cast %135 : vector<1x8x32xf32> to vector<8x32xf32>
      %c0_74 = arith.constant 0 : index
      %c0_75 = arith.constant 0 : index
      %137 = vector.load %arg16[%c0_74, %c0_75] : memref<32x128xf32, #tpu.memory_space<vmem>>, vector<32x128xf32>
      %cst_76 = arith.constant dense<0.000000e+00> : vector<8x128xf32>
      %138 = tpu.matmul %136, %137, %cst_76 {dimension_numbers = #tpu.dot_dimension_numbers<[1], [0], [0], [1], [0, 0, 1, 1], [], []>} : vector<8x32xf32>, vector<32x128xf32>, vector<8x128xf32> -> vector<8x128xf32>
      %c0_77 = arith.constant 0 : index
      %c128 = arith.constant 128 : index
      %139 = vector.load %arg14[%c0_77, %c128] : memref<8x256xf32, #tpu.memory_space<vmem>>, vector<8x128xf32>
      tpu.vector_store %arg14[%c0_77, %c128], %138 {strides = array<i32>} : memref<8x256xf32, #tpu.memory_space<vmem>>, vector<8x128xf32>,
    } else {
    }
    %c0 = arith.constant 0 : index
    %c0_3 = arith.constant 0 : index
    %c0_4 = arith.constant 0 : index
    %6 = vector.load %arg3[%c0, %c0_3, %c0_4] : memref<1x8x128xf32, #tpu.memory_space<vmem>>, vector<1x8x128xf32>
    %7 = vector.shape_cast %6 : vector<1x8x128xf32> to vector<8x128xf32>
    %8 = vector.extract_strided_slice %7 {offsets = [0, 0], sizes = [8, 1], strides = [1, 1]} : vector<8x128xf32> to vector<8x1xf32>
    %9 = tpu.iota {dimensions = array<i32: 0>} : vector<8x1xi32>
    %10 = arith.index_cast %arg0 : i32 to index
    %11 = memref.load %arg1[%10] : memref<3xi32, #tpu.memory_space<smem>>
    %12 = vector.broadcast %11 : i32 to vector<8x1xi32>
    %13 = arith.cmpi slt, %9, %12 : vector<8x1xi32>
    %c0_5 = arith.constant 0 : index
    %c0_6 = arith.constant 0 : index
    %14 = vector.load %arg14[%c0_5, %c0_6] : memref<8x256xf32, #tpu.memory_space<vmem>>, vector<8x256xf32>
    %15 = vector.broadcast %8 : vector<8x1xf32> to vector<8x256xf32>
    %16 = arith.divf %14, %15 : vector<8x256xf32>
    %17 = arith.truncf %16 : vector<8x256xf32> to vector<8x256xbf16>
    %c0_7 = arith.constant 0 : index
    %c0_8 = arith.constant 0 : index
    %18 = vector.load %arg6[%c0_7, %c0_8] : memref<256x128xbf16, #tpu.memory_space<vmem>>, vector<256x128xbf16>
    %cst = arith.constant dense<0.000000e+00> : vector<8x128xf32>
    %19 = tpu.matmul %17, %18, %cst {dimension_numbers = #tpu.dot_dimension_numbers<[1], [0], [0], [1], [0, 0, 1, 1], [], []>} : vector<8x256xbf16>, vector<256x128xbf16>, vector<8x128xf32> -> vector<8x128xf32>
    %c0_9 = arith.constant 0 : index
    %c0_10 = arith.constant 0 : index
    %20 = vector.load %arg7[%c0_9, %c0_10] : memref<1x128xf32, #tpu.memory_space<vmem>>, vector<1x128xf32>
    %21 = vector.broadcast %20 : vector<1x128xf32> to vector<8x128xf32>
    %22 = arith.addf %19, %21 : vector<8x128xf32>
    %23 = math.tanh %22 : vector<8x128xf32>
    %cst_11 = arith.constant 0.000000e+00 : f32
    %24 = vector.shape_cast %13 : vector<8x1xi1> to vector<8x1xi1>
    %25 = vector.broadcast %24 : vector<8x1xi1> to vector<8x128xi1>
    %26 = vector.broadcast %cst_11 : f32 to vector<8x128xf32>
    %27 = arith.select %25, %23, %26 : vector<8x128xi1>, vector<8x128xf32>
    %c0_12 = arith.constant 0 : index
    %c0_13 = arith.constant 0 : index
    %c0_14 = arith.constant 0 : index
    %28 = vector.load %arg11[%c0_12, %c0_13, %c0_14] : memref<1x8x128xf32, #tpu.memory_space<vmem>>, vector<1x8x128xf32>
    %29 = vector.shape_cast %28 : vector<1x8x128xf32> to vector<8x128xf32>
    %30 = vector.shape_cast %27 : vector<8x128xf32> to vector<1x8x128xf32>
    tpu.vector_store %arg11[%c0_12, %c0_13, %c0_14], %30 {strides = array<i32>} : memref<1x8x128xf32, #tpu.memory_space<vmem>>, vector<1x8x128xf32>,
    %31 = arith.truncf %27 : vector<8x128xf32> to vector<8x128xbf16>
    %c0_15 = arith.constant 0 : index
    %c0_16 = arith.constant 0 : index
    %32 = vector.load %arg8[%c0_15, %c0_16] : memref<128x256xbf16, #tpu.memory_space<vmem>>, vector<128x256xbf16>
    %cst_17 = arith.constant dense<0.000000e+00> : vector<8x256xf32>
    %33 = tpu.matmul %31, %32, %cst_17 {dimension_numbers = #tpu.dot_dimension_numbers<[1], [0], [0], [1], [0, 0, 1, 1], [], []>} : vector<8x128xbf16>, vector<128x256xbf16>, vector<8x256xf32> -> vector<8x256xf32>
    %34 = vector.extract_strided_slice %33 {offsets = [0, 0], sizes = [8, 128], strides = [1, 1]} : vector<8x256xf32> to vector<8x128xf32>
    %c0_18 = arith.constant 0 : index
    %c0_19 = arith.constant 0 : index
    %35 = vector.load %arg9[%c0_18, %c0_19] : memref<1x128xf32, #tpu.memory_space<vmem>>, vector<1x128xf32>
    %36 = vector.broadcast %35 : vector<1x128xf32> to vector<8x128xf32>
    %37 = arith.addf %34, %36 : vector<8x128xf32>
    %38 = vector.extract_strided_slice %33 {offsets = [0, 128], sizes = [8, 128], strides = [1, 1]} : vector<8x256xf32> to vector<8x128xf32>
    %cst_20 = arith.constant dense<0.000000e+00> : vector<8xf32>
    %39 = vector.multi_reduction <add>, %37, %cst_20 [1] : vector<8x128xf32> to vector<8xf32>
    %40 = vector.shape_cast %39 : vector<8xf32> to vector<8x1xf32>
    %cst_21 = arith.constant 0.166666672 : f32
    %41 = vector.broadcast %cst_21 : f32 to vector<8x1xf32>
    %42 = arith.mulf %40, %41 : vector<8x1xf32>
    %43 = vector.broadcast %42 : vector<8x1xf32> to vector<8x128xf32>
    %44 = arith.subf %37, %43 : vector<8x128xf32>
    %45 = tpu.iota {dimensions = array<i32: 1>} : vector<8x128xi32>
    %c6_i32 = arith.constant 6 : i32
    %46 = vector.broadcast %c6_i32 : i32 to vector<8x128xi32>
    %47 = arith.cmpi slt, %45, %46 : vector<8x128xi32>
    %cst_22 = arith.constant 0.000000e+00 : f32
    %48 = vector.broadcast %cst_22 : f32 to vector<8x128xf32>
    %49 = arith.select %47, %44, %48 : vector<8x128xi1>, vector<8x128xf32>
    %50 = arith.mulf %49, %49 : vector<8x128xf32>
    %cst_23 = arith.constant dense<0.000000e+00> : vector<8xf32>
    %51 = vector.multi_reduction <add>, %50, %cst_23 [1] : vector<8x128xf32> to vector<8xf32>
    %52 = vector.shape_cast %51 : vector<8xf32> to vector<8x1xf32>
    %cst_24 = arith.constant 0.166666672 : f32
    %53 = vector.broadcast %cst_24 : f32 to vector<8x1xf32>
    %54 = arith.mulf %52, %53 : vector<8x1xf32>
    %cst_25 = arith.constant 9.99999974E-6 : f32
    %55 = vector.broadcast %cst_25 : f32 to vector<8x1xf32>
    %56 = arith.addf %54, %55 : vector<8x1xf32>
    %57 = math.rsqrt %56 : vector<8x1xf32>
    %58 = vector.broadcast %57 : vector<8x1xf32> to vector<8x128xf32>
    %59 = arith.mulf %49, %58 : vector<8x128xf32>
    %cst_26 = arith.constant 0.000000e+00 : f32
    %60 = vector.broadcast %cst_26 : f32 to vector<8x128xf32>
    %61 = arith.maximumf %59, %60 : vector<8x128xf32>
    %cst_27 = arith.constant 0.000000e+00 : f32
    %62 = vector.shape_cast %13 : vector<8x1xi1> to vector<8x1xi1>
    %63 = vector.broadcast %62 : vector<8x1xi1> to vector<8x128xi1>
    %64 = vector.broadcast %cst_27 : f32 to vector<8x128xf32>
    %65 = arith.select %63, %61, %64 : vector<8x128xi1>, vector<8x128xf32>
    %c0_28 = arith.constant 0 : index
    %c0_29 = arith.constant 0 : index
    %66 = vector.load %arg15[%c0_28, %c0_29] : memref<8x128xf32, #tpu.memory_space<vmem>>, vector<8x128xf32>
    tpu.vector_store %arg15[%c0_28, %c0_29], %65 {strides = array<i32>} : memref<8x128xf32, #tpu.memory_space<vmem>>, vector<8x128xf32>,
    %c0_30 = arith.constant 0 : index
    %c0_31 = arith.constant 0 : index
    %c0_32 = arith.constant 0 : index
    %67 = vector.load %arg12[%c0_30, %c0_31, %c0_32] : memref<1x8x128xf32, #tpu.memory_space<vmem>>, vector<1x8x128xf32>
    %68 = vector.shape_cast %67 : vector<1x8x128xf32> to vector<8x128xf32>
    %69 = vector.shape_cast %65 : vector<8x128xf32> to vector<1x8x128xf32>
    tpu.vector_store %arg12[%c0_30, %c0_31, %c0_32], %69 {strides = array<i32>} : memref<1x8x128xf32, #tpu.memory_space<vmem>>, vector<1x8x128xf32>,
    %70 = vector.extract_strided_slice %7 {offsets = [0, 1], sizes = [8, 1], strides = [1, 1]} : vector<8x128xf32> to vector<8x1xf32>
    %71 = vector.broadcast %70 : vector<8x1xf32> to vector<8x128xf32>
    %72 = arith.mulf %71, %38 : vector<8x128xf32>
    %c0_33 = arith.constant 0 : index
    %c0_34 = arith.constant 0 : index
    %73 = vector.load %arg10[%c0_33, %c0_34] : memref<1x128xf32, #tpu.memory_space<vmem>>, vector<1x128xf32>
    %74 = vector.broadcast %73 : vector<1x128xf32> to vector<8x128xf32>
    %75 = arith.addf %72, %74 : vector<8x128xf32>
    %cst_35 = arith.constant 0.000000e+00 : f32
    %76 = vector.shape_cast %13 : vector<8x1xi1> to vector<8x1xi1>
    %77 = vector.broadcast %76 : vector<8x1xi1> to vector<8x128xi1>
    %78 = vector.broadcast %cst_35 : f32 to vector<8x128xf32>
    %79 = arith.select %77, %75, %78 : vector<8x128xi1>, vector<8x128xf32>
    %c0_36 = arith.constant 0 : index
    %c0_37 = arith.constant 0 : index
    %80 = vector.load %arg16[%c0_36, %c0_37] : memref<32x128xf32, #tpu.memory_space<vmem>>, vector<8x128xf32>
    tpu.vector_store %arg16[%c0_36, %c0_37], %79 {strides = array<i32>} : memref<32x128xf32, #tpu.memory_space<vmem>>, vector<8x128xf32>,
    %81 = arith.truncf %79 : vector<8x128xf32> to vector<8x128xbf16>
    %c0_38 = arith.constant 0 : index
    %c0_39 = arith.constant 0 : index
    %c0_40 = arith.constant 0 : index
    %c0_41 = arith.constant 0 : index
    %82 = vector.load %arg13[%c0_38, %c0_39, %c0_40, %c0_41] : memref<1x4x8x128xbf16, #tpu.memory_space<vmem>>, vector<1x1x8x128xbf16>
    %83 = vector.shape_cast %82 : vector<1x1x8x128xbf16> to vector<8x128xbf16>
    %84 = vector.shape_cast %81 : vector<8x128xbf16> to vector<1x1x8x128xbf16>
    tpu.vector_store %arg13[%c0_38, %c0_39, %c0_40, %c0_41], %84 {strides = array<i32>} : memref<1x4x8x128xbf16, #tpu.memory_space<vmem>>, vector<1x1x8x128xbf16>,
    %85 = vector.extract_strided_slice %7 {offsets = [0, 2], sizes = [8, 1], strides = [1, 1]} : vector<8x128xf32> to vector<8x1xf32>
    %86 = vector.broadcast %85 : vector<8x1xf32> to vector<8x128xf32>
    %87 = arith.mulf %86, %38 : vector<8x128xf32>
    %c0_42 = arith.constant 0 : index
    %c0_43 = arith.constant 0 : index
    %88 = vector.load %arg10[%c0_42, %c0_43] : memref<1x128xf32, #tpu.memory_space<vmem>>, vector<1x128xf32>
    %89 = vector.broadcast %88 : vector<1x128xf32> to vector<8x128xf32>
    %90 = arith.addf %87, %89 : vector<8x128xf32>
    %cst_44 = arith.constant 0.000000e+00 : f32
    %91 = vector.shape_cast %13 : vector<8x1xi1> to vector<8x1xi1>
    %92 = vector.broadcast %91 : vector<8x1xi1> to vector<8x128xi1>
    %93 = vector.broadcast %cst_44 : f32 to vector<8x128xf32>
    %94 = arith.select %92, %90, %93 : vector<8x128xi1>, vector<8x128xf32>
    %c8 = arith.constant 8 : index
    %c0_45 = arith.constant 0 : index
    %95 = vector.load %arg16[%c8, %c0_45] : memref<32x128xf32, #tpu.memory_space<vmem>>, vector<8x128xf32>
    tpu.vector_store %arg16[%c8, %c0_45], %94 {strides = array<i32>} : memref<32x128xf32, #tpu.memory_space<vmem>>, vector<8x128xf32>,
    %96 = arith.truncf %94 : vector<8x128xf32> to vector<8x128xbf16>
    %c0_46 = arith.constant 0 : index
    %c1 = arith.constant 1 : index
    %c0_47 = arith.constant 0 : index
    %c0_48 = arith.constant 0 : index
    %97 = vector.load %arg13[%c0_46, %c1, %c0_47, %c0_48] : memref<1x4x8x128xbf16, #tpu.memory_space<vmem>>, vector<1x1x8x128xbf16>
    %98 = vector.shape_cast %97 : vector<1x1x8x128xbf16> to vector<8x128xbf16>
    %99 = vector.shape_cast %96 : vector<8x128xbf16> to vector<1x1x8x128xbf16>
    tpu.vector_store %arg13[%c0_46, %c1, %c0_47, %c0_48], %99 {strides = array<i32>} : memref<1x4x8x128xbf16, #tpu.memory_space<vmem>>, vector<1x1x8x128xbf16>,
    %100 = vector.extract_strided_slice %7 {offsets = [0, 3], sizes = [8, 1], strides = [1, 1]} : vector<8x128xf32> to vector<8x1xf32>
    %101 = vector.broadcast %100 : vector<8x1xf32> to vector<8x128xf32>
    %102 = arith.mulf %101, %38 : vector<8x128xf32>
    %c0_49 = arith.constant 0 : index
    %c0_50 = arith.constant 0 : index
    %103 = vector.load %arg10[%c0_49, %c0_50] : memref<1x128xf32, #tpu.memory_space<vmem>>, vector<1x128xf32>
    %104 = vector.broadcast %103 : vector<1x128xf32> to vector<8x128xf32>
    %105 = arith.addf %102, %104 : vector<8x128xf32>
    %cst_51 = arith.constant 0.000000e+00 : f32
    %106 = vector.shape_cast %13 : vector<8x1xi1> to vector<8x1xi1>
    %107 = vector.broadcast %106 : vector<8x1xi1> to vector<8x128xi1>
    %108 = vector.broadcast %cst_51 : f32 to vector<8x128xf32>
    %109 = arith.select %107, %105, %108 : vector<8x128xi1>, vector<8x128xf32>
    %c16 = arith.constant 16 : index
    %c0_52 = arith.constant 0 : index
    %110 = vector.load %arg16[%c16, %c0_52] : memref<32x128xf32, #tpu.memory_space<vmem>>, vector<8x128xf32>
    tpu.vector_store %arg16[%c16, %c0_52], %109 {strides = array<i32>} : memref<32x128xf32, #tpu.memory_space<vmem>>, vector<8x128xf32>,
    %111 = arith.truncf %109 : vector<8x128xf32> to vector<8x128xbf16>
    %c0_53 = arith.constant 0 : index
    %c2 = arith.constant 2 : index
    %c0_54 = arith.constant 0 : index
    %c0_55 = arith.constant 0 : index
    %112 = vector.load %arg13[%c0_53, %c2, %c0_54, %c0_55] : memref<1x4x8x128xbf16, #tpu.memory_space<vmem>>, vector<1x1x8x128xbf16>
    %113 = vector.shape_cast %112 : vector<1x1x8x128xbf16> to vector<8x128xbf16>
    %114 = vector.shape_cast %111 : vector<8x128xbf16> to vector<1x1x8x128xbf16>
    tpu.vector_store %arg13[%c0_53, %c2, %c0_54, %c0_55], %114 {strides = array<i32>} : memref<1x4x8x128xbf16, #tpu.memory_space<vmem>>, vector<1x1x8x128xbf16>,
    %115 = vector.extract_strided_slice %7 {offsets = [0, 4], sizes = [8, 1], strides = [1, 1]} : vector<8x128xf32> to vector<8x1xf32>
    %116 = vector.broadcast %115 : vector<8x1xf32> to vector<8x128xf32>
    %117 = arith.mulf %116, %38 : vector<8x128xf32>
    %c0_56 = arith.constant 0 : index
    %c0_57 = arith.constant 0 : index
    %118 = vector.load %arg10[%c0_56, %c0_57] : memref<1x128xf32, #tpu.memory_space<vmem>>, vector<1x128xf32>
    %119 = vector.broadcast %118 : vector<1x128xf32> to vector<8x128xf32>
    %120 = arith.addf %117, %119 : vector<8x128xf32>
    %cst_58 = arith.constant 0.000000e+00 : f32
    %121 = vector.shape_cast %13 : vector<8x1xi1> to vector<8x1xi1>
    %122 = vector.broadcast %121 : vector<8x1xi1> to vector<8x128xi1>
    %123 = vector.broadcast %cst_58 : f32 to vector<8x128xf32>
    %124 = arith.select %122, %120, %123 : vector<8x128xi1>, vector<8x128xf32>
    %c24 = arith.constant 24 : index
    %c0_59 = arith.constant 0 : index
    %125 = vector.load %arg16[%c24, %c0_59] : memref<32x128xf32, #tpu.memory_space<vmem>>, vector<8x128xf32>
    tpu.vector_store %arg16[%c24, %c0_59], %124 {strides = array<i32>} : memref<32x128xf32, #tpu.memory_space<vmem>>, vector<8x128xf32>,
    %126 = arith.truncf %124 : vector<8x128xf32> to vector<8x128xbf16>
    %c0_60 = arith.constant 0 : index
    %c3 = arith.constant 3 : index
    %c0_61 = arith.constant 0 : index
    %c0_62 = arith.constant 0 : index
    %127 = vector.load %arg13[%c0_60, %c3, %c0_61, %c0_62] : memref<1x4x8x128xbf16, #tpu.memory_space<vmem>>, vector<1x1x8x128xbf16>
    %128 = vector.shape_cast %127 : vector<1x1x8x128xbf16> to vector<8x128xbf16>
    %129 = vector.shape_cast %126 : vector<8x128xbf16> to vector<1x1x8x128xbf16>
    tpu.vector_store %arg13[%c0_60, %c3, %c0_61, %c0_62], %129 {strides = array<i32>} : memref<1x4x8x128xbf16, #tpu.memory_space<vmem>>, vector<1x1x8x128xbf16>,
    return
  }
  func.func @transform_0(%arg0: i32, %arg1: memref<3xi32, #tpu.memory_space<smem>>) -> (i32, i32) {
    %c0_i32 = arith.constant 0 : i32
    %c0_i32_0 = arith.constant 0 : i32
    %c0_i32_1 = arith.constant 0 : i32
    return %c0_i32, %c0_i32_0 : i32, i32
  }
  func.func @transform_1(%arg0: i32, %arg1: memref<3xi32, #tpu.memory_space<smem>>) -> (i32, i32, i32) {
    %c0_i32 = arith.constant 0 : i32
    %c0_i32_0 = arith.constant 0 : i32
    %c0_i32_1 = arith.constant 0 : i32
    return %arg0, %c0_i32, %c0_i32_0 : i32, i32, i32
  }
  func.func @transform_2(%arg0: i32, %arg1: memref<3xi32, #tpu.memory_space<smem>>) -> (i32, i32, i32) {
    %c0_i32 = arith.constant 0 : i32
    %c0_i32_0 = arith.constant 0 : i32
    %c0_i32_1 = arith.constant 0 : i32
    return %arg0, %c0_i32, %c0_i32_0 : i32, i32, i32
  }
  func.func @transform_3(%arg0: i32, %arg1: memref<3xi32, #tpu.memory_space<smem>>) -> (i32, i32, i32) {
    %c0_i32 = arith.constant 0 : i32
    %c0_i32_0 = arith.constant 0 : i32
    %c0_i32_1 = arith.constant 0 : i32
    return %arg0, %c0_i32, %c0_i32_0 : i32, i32, i32
  }
  func.func @transform_4(%arg0: i32, %arg1: memref<3xi32, #tpu.memory_space<smem>>) -> (i32, i32) {
    %c0_i32 = arith.constant 0 : i32
    %c0_i32_0 = arith.constant 0 : i32
    %c0_i32_1 = arith.constant 0 : i32
    return %c0_i32, %c0_i32_0 : i32, i32
  }
  func.func @transform_5(%arg0: i32, %arg1: memref<3xi32, #tpu.memory_space<smem>>) -> (i32, i32) {
    %c0_i32 = arith.constant 0 : i32
    %c0_i32_0 = arith.constant 0 : i32
    %c0_i32_1 = arith.constant 0 : i32
    return %c0_i32, %c0_i32_0 : i32, i32
  }
  func.func @transform_6(%arg0: i32, %arg1: memref<3xi32, #tpu.memory_space<smem>>) -> (i32, i32) {
    %c0_i32 = arith.constant 0 : i32
    %c0_i32_0 = arith.constant 0 : i32
    %c0_i32_1 = arith.constant 0 : i32
    return %c0_i32, %c0_i32_0 : i32, i32
  }
  func.func @transform_7(%arg0: i32, %arg1: memref<3xi32, #tpu.memory_space<smem>>) -> (i32, i32) {
    %c0_i32 = arith.constant 0 : i32
    %c0_i32_0 = arith.constant 0 : i32
    %c0_i32_1 = arith.constant 0 : i32
    return %c0_i32, %c0_i32_0 : i32, i32
  }
  func.func @transform_8(%arg0: i32, %arg1: memref<3xi32, #tpu.memory_space<smem>>) -> (i32, i32) {
    %c0_i32 = arith.constant 0 : i32
    %c0_i32_0 = arith.constant 0 : i32
    %c0_i32_1 = arith.constant 0 : i32
    return %c0_i32, %c0_i32_0 : i32, i32
  }
  func.func @transform_9(%arg0: i32, %arg1: memref<3xi32, #tpu.memory_space<smem>>) -> (i32, i32, i32) {
    %c0_i32 = arith.constant 0 : i32
    %c0_i32_0 = arith.constant 0 : i32
    %c0_i32_1 = arith.constant 0 : i32
    return %arg0, %c0_i32, %c0_i32_0 : i32, i32, i32
  }
  func.func @transform_10(%arg0: i32, %arg1: memref<3xi32, #tpu.memory_space<smem>>) -> (i32, i32, i32) {
    %c0_i32 = arith.constant 0 : i32
    %c0_i32_0 = arith.constant 0 : i32
    %c0_i32_1 = arith.constant 0 : i32
    return %arg0, %c0_i32, %c0_i32_0 : i32, i32, i32
  }
  func.func @transform_11(%arg0: i32, %arg1: memref<3xi32, #tpu.memory_space<smem>>) -> (i32, i32, i32, i32) {
    %c0_i32 = arith.constant 0 : i32
    %c0_i32_0 = arith.constant 0 : i32
    %c0_i32_1 = arith.constant 0 : i32
    %c0_i32_2 = arith.constant 0 : i32
    return %arg0, %c0_i32, %c0_i32_0, %c0_i32_1 : i32, i32, i32, i32
  }
}

</mosaic_0001>

<bundles_post_ra>
// kernel: deconv_tree_forward.1
= control target key start
LH: loop header
LB: loop body
LE: loop exit
PB: predicated region body
PF: predicated region fallthrough
CT: control target
= control target key end

     0   :  { %s1998_s21 = smov [#allocation6]   ;;  %s2499_s0 = inlined_call_operand.hbm [shape: s32[3], index: 0, kind: input, shape index: {}]   ;;  %s2500_s1 = inlined_call_operand.hbm [shape: f32[8,128], index: 1, kind: input, shape index: {}]   ;;  %s2501_s2 = inlined_call_operand.hbm [shape: f32[3,8,128], index: 2, kind: input, shape index: {}]   ;;  %s2502_s3 = inlined_call_operand.hbm [shape: f32[3,8,8], index: 3, kind: input, shape index: {}]   ;;  %s2503_s4 = inlined_call_operand.hbm [shape: f32[3,8,32], index: 4, kind: input, shape index: {}]   ;;  %s2504_s5 = inlined_call_operand.hbm [shape: bf16[256,128], index: 5, kind: input, shape index: {}]   ;;  %s2505_s6 = inlined_call_operand.vmem [shape: f32[1,128], index: 6, kind: input, shape index: {}]   ;;  %s2506_s7 = inlined_call_operand.hbm [shape: bf16[128,256], index: 7, kind: input, shape index: {}]   ;;  %s2507_s8 = inlined_call_operand.vmem [shape: f32[1,128], index: 8, kind: input, shape index: {}]   ;;  %s2508_s9 = inlined_call_operand.vmem [shape: f32[1,128], index: 9, kind: input, shape index: {}]   ;;  %s2509_s10 = inlined_call_operand.hbm [shape: f32[3,8,128], index: 10, kind: output, shape index: {0}]   ;;  %s2510_s11 = inlined_call_operand.hbm [shape: f32[3,8,128], index: 11, kind: output, shape index: {1}]   ;;  %s2511_s12 = inlined_call_operand.hbm [shape: bf16[3,4,8,128], index: 12, kind: output, shape index: {2}]  }
   0x1   :  { %2530 = sst [smem:[#allocation35_spill]] %s2500_s1 }
   0x2   :  { %2531 = sst [smem:[#allocation36_spill]] %s2501_s2 }
   0x3   :  { %2532 = sst [smem:[#allocation37_spill]] %s2504_s5 }
   0x4   :  { %2533 = sst [smem:[#allocation38_spill]] %s2509_s10 }
   0x5   :  { %2534 = sst [smem:[#allocation39_spill]] %s2510_s11 }
   0x6   :  { %2535 = sst [smem:[#allocation40_spill]] %s2511_s12 }
   0x7   :  { %19 = dma.hbm_to_smem %s2499_s0, 16, %s1998_s21, [#allocation5] }
   0x8   :  { %1952 = dma.done.wait [#allocation5], 16 }
   0x9   :  { %1953 = vsyncadd [#allocation5], 4294967280 }
   0xa   :  { %21 = sfence }
   0xb   :  { %22 = vsyncpa [#allocation8], 0 }
   0xc   :  { %23 = vsyncpa [#allocation11], 0 }
   0xd   :  { %25 = vsyncpa [#allocation11 + $0x1], 0 }
   0xe   :  { %26 = vsyncpa [#allocation14], 0 }
   0xf   :  { %28 = vsyncpa [#allocation14 + $0x1], 0 }
  0x10   :  { %29 = vsyncpa [#allocation17], 0 }
  0x11   :  { %30 = vsyncpa [#allocation9], 0 }
  0x12   :  { %32 = vsyncpa [#allocation9 + $0x1], 0 }
  0x13   :  { %33 = vsyncpa [#allocation20], 0 }
  0x14   :  { %35 = vsyncpa [#allocation20 + $0x1], 0  ;;  %s2090_s24 = smov 0   ;;  %s2092_s25 = smov 0  }
  0x15   :  { %s2094_s26 = smov 0   ;;  %s2096_s0 = smov 0  }
  0x16 LB: > { %2536 = sst [smem:[#allocation30_spill]] %s1984_s24  ;;  %s2111_s27 = sadd.s32 4294967295, %s1996_s0   ;;  %s1996_s0 = sphi %s2096_s0, %s2576_s0   ;;  %s1992_s26 = sphi %s2094_s26, %s2578_s26   ;;  %s1988_s25 = sphi %s2092_s25, %s2580_s25   ;;  %s1984_s24 = sphi %s2090_s24, %s2579_s24  }
  0x17   : > { %2537 = sst [smem:[#allocation31_spill]] %s1992_s26  ;;  %s2512_s28 = sadd.s32 4294967294, %s1996_s0  }
  0x18   : > { %p82_p0 = scmp.ne.s32.totalorder %s1988_s25, %s1984_s24  ;;  %p2520_p1 = scmp.eq.s32.totalorder %s2111_s27, 0 }
  0x19   : > { %p263_p2 = scmp.eq.s32.totalorder %s2111_s27, 2  ;;  %p269_p3 = scmp.eq.s32.totalorder %s2512_s28, 2 }
  0x1a   : > { %p2122_p4 = por %p2520_p1, %p82_p0  ;;  %p1400_p5 = scmp.ge.s32.totalorder %s1996_s0, 1 }
  0x1b   : > { %p2127_p6 = por %p269_p3, %p82_p0  ;;  %p328_p7 = scmp.lt.s32.totalorder %s1996_s0, 4 }
  0x1c   : > { %s2538_s29 = scalar_select %p2122_p4, 1, 0 }
  0x1d   : > { %s2539_s30 = scalar_select %p2127_p6, 1, 0 }
  0x1e   : > { %p2133_p9 = pnand %p1400_p5, %p328_p7  ;;  %s1999_s14 = smov [#allocation15]  }
  0x1f   : > { %2540 = sst [smem:[#allocation32_spill]] %s2539_s30  ;;  %s351_s15 = sshll.u32 %s1999_s14, 4  ;;  %s352_s15 = int_to_ptr.vmem [resolvable:$true] %s351_s15 }
  0x20   : > { %s2541_s13 = scalar_select %p2133_p9, 1, 0 }
  0x21   : > { %p1548_p10 = pneg %p2133_p9  ;;  %s2146_s17 = sadd.s32 1, %s1996_s0  }
  0x22   : > { %2543 = sst [smem:[#allocation33_spill]] %s2146_s17  ;;  %s69_s18 = sadd.s32 1, %s1992_s26 }
  0x23   : > { %p2141_p11 = pnand %p1548_p10, %p2520_p1  ;;  %s66_s19 = ssub.s32 %s1996_s0, %s2146_s17 }
  0x24   : > { %s1707_s20 = scalar_lea.vmem %s352_s15, 2048  ;;  %p1715_p5 = scmp.lt.s32.totalorder %s352_s15, %s352_s15 }
  0x25   : > { %s2542_s16 = scalar_select %p2141_p11, 1, 0 }
  0x26   : > { %p2521_p12 = pneg %p2141_p11  ;;  %p1708_p13 = scmp.ne.s32.totalorder %s352_s15, %s1707_s20 }
  0x27   : > { %p1716_p7 = scmp.lt.s32.totalorder %s1707_s20, %s1707_s20 }
  0x28   : > { %p1710_p0 = pnand %p1708_p13, %p2521_p12 }
  0x29   : > { %p1717_p10 = por %p1716_p7, %p1715_p5 }
  0x2a   : > { %p1711_p3 = pneg %p1710_p0 }
  0x2c   : > { %p1718_p8 = pnand %p1717_p10, %p1711_p3 }
  0x2e   : > { %1721 = shalt.err (!%p1718_p8)
}
  0x2f   : > { %s2000_s21 = smov 64   ;;  %s2001_s22 = smov 4  }
  0x30   : > { %s2544_s5 = sld [smem:[#allocation37_spill]]  ;;  %p67_p13 = scmp.eq.s32.totalorder %s66_s19, 0 }
  0x31   : > { %p76_p0 = scmp.ne.s32.totalorder %s1992_s26, %s1988_s25  ;;  %p77_p8 = scmp.eq.s32.totalorder %s1996_s0, 0 }
  0x32   : > { %p1581_p3 = scmp.lt.s32.totalorder %s1996_s0, 3  ;;  %s389_s30 = sand.u32 1, %s1992_s26  }
  0x33   : > { %s2166_s20 = scalar_select %p67_p13, %s1992_s26, %s69_s18  }
  0x34   : > { %p78_p5 = por %p77_p8, %p76_p0  ;;  %p2170_p7 = por %p263_p2, %p76_p0 }
  0x35   : > { %2545 = sst [smem:[#allocation34_spill]] %s2166_s20  ;;  %s2176_s24 = sshll.u32 %s389_s30, 3 }
  0x36   : > { %1554 = dma.hbm_to_vmem [thread:$0]  (!%p2141_p11), %s2544_s5, 2048, %s352_s15, [#allocation14], %s2000_s21, %s2000_s21, %s2001_s22  }
  0x37   : > { %s2546_s28 = scalar_select %p2170_p7, 1, 0 }
  0x38   : > { %s2179_s23 = sshll.u32 %s1996_s0, 7  ;;  %s2547_s2 = sld [smem:[#allocation36_spill]] }
  0x39   : > { %s391_s18 = scalar_lea.vmem [#allocation10], %s2176_s24  ;;  %p2190_p2 = pnand %p1581_p3, %p78_p5 }
  0x3a   : > { %s398_s22 = sshll.u32 %s391_s18, 4  ;;  %s2002_s30 = smov [#allocation7]   ;;  %s2188_s22 = int_to_ptr.vmem [resolvable:$true] %s398_s22 }
  0x3b   : > { %s341_s17 = sshll.u32 %s2002_s30, 4  ;;  %s2549_s5 = sand.u32 1, %s1996_s0   ;;  %s342_s17 = int_to_ptr.vmem [resolvable:$true] %s341_s17 }
  0x3c   : > { %s2196_s20 = scalar_lea.sflag [#allocation11], %s2549_s5  ;;  %p2202_p13 = pneg %p2190_p2 }
  0x3e   : > { %s2185_s21 = scalar_lea.hbm %s2547_s2, %s2179_s23  ;;  %s1727_s12 = scalar_lea.hbm %s2547_s2, 384 }
  0x3f   : > { %s1722_s15 = scalar_lea.hbm %s2185_s21, 128  ;;  %p1728_p3 = scmp.lt.s32.totalorder %s2185_s21, %s2547_s2 }
  0x40   : > { %p1723_p10 = scmp.ne.s32.totalorder %s2185_s21, %s1722_s15  ;;  %p1729_p5 = scmp.lt.s32.totalorder %s1727_s12, %s1722_s15 }
  0x41   : > { %s2550_s19 = scalar_select %p2202_p13, 1, 0 }
  0x42   : > { %p1725_p0 = pnand %p2202_p13, %p1723_p10  ;;  %p1730_p1 = por %p1729_p5, %p1728_p3 }
  0x44   : > { %p1726_p8 = pneg %p1725_p0 }
  0x46   : > { %p1731_p12 = pnand %p1730_p1, %p1726_p8 }
  0x48   : > { %1734 = shalt.err (!%p1731_p12)
}
  0x49   : > { %s1735_s5 = scalar_lea.vmem %s2188_s22, 128  ;;  %s2003_s10 = smov [#allocation10]  }
  0x4a   : > { %p1736_p6 = scmp.ne.s32.totalorder %s2188_s22, %s1735_s5  ;;  %s1740_s26 = sshll.u32 %s2003_s10, 4  ;;  %s1741_s26 = int_to_ptr.vmem [resolvable:$false] %s1740_s26 }
  0x4b   : > { %s1742_s18 = scalar_lea.vmem %s1741_s26, 256  ;;  %p1743_p7 = scmp.lt.s32.totalorder %s2188_s22, %s1741_s26 }
  0x4c   : > { %p1738_p10 = pnand %p1736_p6, %p2202_p13  ;;  %p1744_p4 = scmp.lt.s32.totalorder %s1742_s18, %s1735_s5 }
  0x4e   : > { %p1739_p0 = pneg %p1738_p10  ;;  %p1745_p9 = por %p1744_p4, %p1743_p7 }
  0x50   : > { %p1746_p11 = pnand %p1745_p9, %p1739_p0 }
  0x52   : > { %1749 = shalt.err (!%p1746_p11)
}
  0x53   : > { %1561 = dma.hbm_to_vmem [thread:$0]  (!%p2190_p2), %s2185_s21, 128, %s2188_s22, %s2196_s20  }
  0x54   : > { %s1761_s11 = scalar_lea.vmem %s342_s17, 128  ;;  %p2551_p6 = scmp.ne.s32.totalorder %s2542_s16, 0 }
  0x55   : > { %p1762_p1 = scmp.ne.s32.totalorder %s342_s17, %s1761_s11  ;;  %p1769_p5 = scmp.lt.s32.totalorder %s342_s17, %s342_s17 }
  0x56   : > { %p2552_p12 = pneg %p2551_p6  ;;  %p1770_p10 = scmp.lt.s32.totalorder %s1761_s11, %s1761_s11 }
  0x58   : > { %p1764_p8 = pnand %p1762_p1, %p2552_p12  ;;  %p1771_p13 = por %p1770_p10, %p1769_p5 }
  0x5a   : > { %p1765_p3 = pneg %p1764_p8 }
  0x5c   : > { %p1772_p4 = pnand %p1771_p13, %p1765_p3 }
  0x5e   : > { %1775 = shalt.err (!%p1772_p4)
}
  0x5f   : > { %s2553_s1 = sld [smem:[#allocation35_spill]]  ;;  %s2004_s21 = smov [#allocation16]  }
  0x60   : > { %s367_s22 = sshll.u32 %s2004_s21, 4  ;;  %p2554_p11 = pmov %p2552_p12  ;;  %s368_s22 = int_to_ptr.vmem [resolvable:$true] %s367_s22 }
  0x61   : > { %s1787_s15 = scalar_lea.vmem %s368_s22, 2048  ;;  %p1795_p1 = scmp.lt.s32.totalorder %s368_s22, %s368_s22 }
  0x62   : > { %p1788_p9 = scmp.ne.s32.totalorder %s368_s22, %s1787_s15  ;;  %p1796_p12 = scmp.lt.s32.totalorder %s1787_s15, %s1787_s15 }
  0x64   : > { %p1790_p7 = pnand %p1788_p9, %p2554_p11  ;;  %p1797_p13 = por %p1796_p12, %p1795_p1 }
  0x65   : > { %1551 = dma.hbm_to_vmem [thread:$0]  (!%p2551_p6), %s2553_s1, 128, %s342_s17, [#allocation8]  }
  0x66   : > { %p1791_p0 = pneg %p1790_p7 }
  0x68   : > { %p1798_p8 = pnand %p1797_p13, %p1791_p0 }
  0x6a   : > { %1801 = shalt.err (!%p1798_p8)
}
  0x6b   : > { %s2005_s30 = smov 128   ;;  %s2006_s17 = smov 8  }
  0x6c   : > { %1557 = dma.hbm_to_vmem [thread:$0]  (!%p2551_p6), %s2506_s7, 2048, %s368_s22, [#allocation17], %s2005_s30, %s2005_s30, %s2006_s17  }
  0x6d   : > { %s2245_s10 = scalar_lea.hbm %s2502_s3, %s2179_s23  ;;  %s409_s12 = scalar_lea.vmem [#allocation12], %s2176_s24 }
  0x6e   : > { %s416_s21 = sshll.u32 %s409_s12, 4  ;;  %s2252_s2 = scalar_lea.hbm %s2503_s4, %s2179_s23  ;;  %s417_s21 = int_to_ptr.vmem [resolvable:$true] %s416_s21 }
  0x6f   : > { %s1802_s16 = scalar_lea.hbm %s2245_s10, 128  ;;  %p2555_p5 = scmp.ne.s32.totalorder %s2550_s19, 0 }
  0x70   : > { %p1803_p3 = scmp.ne.s32.totalorder %s2245_s10, %s1802_s16  ;;  %s1807_s17 = scalar_lea.hbm %s2502_s3, 384 }
  0x71   : > { %p1808_p4 = scmp.lt.s32.totalorder %s2245_s10, %s2502_s3  ;;  %p1809_p9 = scmp.lt.s32.totalorder %s1807_s17, %s1802_s16 }
  0x72   : > { %p1805_p6 = pnand %p1803_p3, %p2555_p5 }
  0x73   : > { %p1810_p11 = por %p1809_p9, %p1808_p4 }
  0x74   : > { %p1806_p10 = pneg %p1805_p6 }
  0x76   : > { %p1811_p7 = pnand %p1810_p11, %p1806_p10 }
  0x78   : > { %1814 = shalt.err (!%p1811_p7)
}
  0x79   : > { %s1815_s1 = scalar_lea.vmem %s417_s21, 128  ;;  %s2007_s23 = smov [#allocation12]  }
  0x7a   : > { %p1816_p0 = scmp.ne.s32.totalorder %s417_s21, %s1815_s1  ;;  %s1820_s18 = sshll.u32 %s2007_s23, 4  ;;  %s1821_s18 = int_to_ptr.vmem [resolvable:$false] %s1820_s18 }
  0x7b   : > { %s1822_s11 = scalar_lea.vmem %s1821_s18, 256  ;;  %p1823_p13 = scmp.lt.s32.totalorder %s417_s21, %s1821_s18 }
  0x7c   : > { %p1818_p1 = pnand %p1816_p0, %p2555_p5  ;;  %p1824_p8 = scmp.lt.s32.totalorder %s1822_s11, %s1815_s1 }
  0x7e   : > { %p1819_p12 = pneg %p1818_p1  ;;  %p1825_p3 = por %p1824_p8, %p1823_p13 }
  0x80   : > { %p1826_p6 = pnand %p1825_p3, %p1819_p12 }
  0x82   : > { %1829 = shalt.err (!%p1826_p6)
}
  0x83   : > { %1564 = dma.hbm_to_vmem [thread:$0]  (!%p2190_p2), %s2245_s10, 128, %s417_s21, %s2196_s20  }
  0x84   : > { %s427_s12 = scalar_lea.vmem [#allocation13], %s2176_s24  ;;  %s2556_s16 = sand.u32 1, %s1996_s0  }
  0x85   : > { %s434_s15 = sshll.u32 %s427_s12, 4  ;;  %s424_s22 = scalar_lea.sflag [#allocation14], %s2556_s16  ;;  %s435_s15 = int_to_ptr.vmem [resolvable:$true] %s434_s15 }
  0x86   : > { %s1830_s30 = scalar_lea.hbm %s2252_s2, 128  ;;  %s1835_s26 = scalar_lea.hbm %s2503_s4, 384 }
  0x87   : > { %p1831_p10 = scmp.ne.s32.totalorder %s2252_s2, %s1830_s30  ;;  %p1836_p11 = scmp.lt.s32.totalorder %s2252_s2, %s2503_s4 }
  0x88   : > { %p1837_p7 = scmp.lt.s32.totalorder %s1835_s26, %s1830_s30 }
  0x89   : > { %p1833_p4 = pnand %p1831_p10, %p2555_p5 }
  0x8a   : > { %p1838_p0 = por %p1837_p7, %p1836_p11 }
  0x8b   : > { %p1834_p9 = pneg %p1833_p4 }
  0x8d   : > { %p1839_p1 = pnand %p1838_p0, %p1834_p9 }
  0x8f   : > { %1842 = shalt.err (!%p1839_p1)
}
  0x90   : > { %s1843_s24 = scalar_lea.vmem %s435_s15, 128  ;;  %s2008_s20 = smov [#allocation13]  }
  0x91   : > { %p1844_p12 = scmp.ne.s32.totalorder %s435_s15, %s1843_s24  ;;  %s1848_s10 = sshll.u32 %s2008_s20, 4  ;;  %s1849_s10 = int_to_ptr.vmem [resolvable:$false] %s1848_s10 }
  0x92   : > { %s1850_s21 = scalar_lea.vmem %s1849_s10, 256  ;;  %p1851_p3 = scmp.lt.s32.totalorder %s435_s15, %s1849_s10 }
  0x93   : > { %p1846_p13 = pnand %p1844_p12, %p2555_p5  ;;  %p1852_p6 = scmp.lt.s32.totalorder %s1850_s21, %s1843_s24 }
  0x95   : > { %p1847_p8 = pneg %p1846_p13  ;;  %p1853_p10 = por %p1852_p6, %p1851_p3 }
  0x97   : > { %p1854_p4 = pnand %p1853_p10, %p1847_p8 }
  0x99   : > { %1857 = shalt.err (!%p1854_p4)
}
  0x9a   : > { %1567 = dma.hbm_to_vmem [thread:$0]  (!%p2190_p2), %s2252_s2, 128, %s435_s15, %s424_s22  }
  0x9b   : > { %p2557_p9 = scmp.ne.s32.totalorder %s2541_s13, 0 }
  0x9c   : > { %p2558_p11 = scmp.eq.s32.totalorder (!%p2557_p9), %s2111_s27, 0 }
  0x9d   : > { %443 = sbr.rel (%p2557_p9) target bundleno = 1295 (0x50f), region = 56 }
  0xa2   : > { %1955 = dma.done.wait (%p2558_p11), [#allocation8], 128   ;;  %p2559_p5 = pmov %p2558_p11 }
  0xa3   : > { %s2297_s19 = sand.u32 1, %s2111_s27   ;;  %s2300_s18 = sand.u32 1, %s1988_s25  }
  0xa4   : > { %1957 = vsyncadd (%p2559_p5), [#allocation8], 4294967168  ;;  %s2303_s14 = sshll.u32 %s2300_s18, 3  ;;  %s450_s2 = scalar_lea.sflag [#allocation11], %s2297_s19 }
  0xa5   : > { %s453_s13 = scalar_lea.vmem [#allocation10], %s2303_s14  ;;  %p2560_p2 = scmp.ne.s32.totalorder %s2538_s29, 0 }
  0xa7   : > { %1959 = dma.done.wait (%p2560_p2), %s450_s2, 256  }
  0xa8   : > { %1961 = vsyncadd (%p2560_p2), %s450_s2, 4294967040  ;;  %s462_s11 = scalar_lea.vmem [#allocation12], %s2303_s14  ;;  %s468_s12 = scalar_lea.sflag [#allocation14], %s2297_s19 }
  0xa9   : > { %s471_s15 = scalar_lea.vmem [#allocation13], %s2303_s14 }
  0xaa   : > { %1963 = dma.done.wait (%p2560_p2), %s468_s12, 128  }
  0xab   : > { %1965 = vsyncadd (%p2560_p2), %s468_s12, 4294967168  ;;  %p2561_p7 = pmov %p2559_p5 }
  0xac   : > { %p2562_p0 = pmov %p2559_p5 }
  0xad   : > { %1967 = dma.done.wait (%p2561_p7), [#allocation14], 2048  }
  0xae   : > { %1969 = vsyncadd (%p2562_p0), [#allocation14], 4294965248  ;;  %p2563_p1 = pmov %p2562_p0 }
  0xaf   : > { %p2564_p12 = pmov %p2562_p0 }
  0xb0   : > { %1971 = dma.done.wait (%p2563_p1), [#allocation17], 2048  }
  0xb1   : > { %1973 = vsyncadd (%p2564_p12), [#allocation17], 4294965248  ;;  %s1420_s16 = sshll.u32 %s2300_s18, 4  ;;  %s523_s22 = scalar_lea.vmem [#allocation18], %s2303_s14 }
  0xb2   : > { %s530_s30 = scalar_lea.vmem [#allocation19], %s2303_s14  ;;  %s2329_s29 = scalar_lea.vmem [#allocation21], %s1420_s16 }
  0xb3   : > { %p2565_p13 = scmp.ne.s32.totalorder %s2111_s27, 0 }
  0xb5   : > { %542 = sbr.rel (%p2565_p13) target bundleno = 188 (0xbc), region = 84 }
  0xba   : > { %v544_v0 = vld [vmem:[#allocation7] sm:$0xff]  ;;  %v2009_v1 = vmov 0.0  }
  0xbb   : > { %543 = vst [vmem:[#allocation2] sm:$0xff] %v2009_v1  ;;  %545 = vst [vmem:[#allocation2 + $0x8] sm:$0xff] %v544_v0 }
  0xbc PF: > { %p1422_p8 = scmp.le.s32.totalorder %s2111_s27, 0 }
  0xbe   : > { %549 = sbr.rel (%p1422_p8) target bundleno = 399 (0x18f), region = 88 }
  0xc3   : > { %v631_v2 = vld [vmem:[#allocation4 + $0x18] sm:$0xff]  ;;  %v2010_v4 = vmov 0.0   ;;  %v630_v5 = vld [vmem:[#allocation4] sm:$0xff]  ;;  %vm552_vm0 = vcmask 64512   ;;  %vm2011_vm1 = vmmov 0   ;;  %v629_v7 = vld [vmem:[#allocation4 + $0x10] sm:$0xff] }
  0xc4   : > { %v551_v3 = vld [vmem:[#allocation3] sm:$0xff]  ;;  %1513 = vmatprep.subr.mxu1 %v2010_v4  ;;  %1508 = vmatprep.subr.mxu0 %v2010_v4  ;;  %v628_v8 = vld [vmem:[#allocation4 + $0x8] sm:$0xff]  ;;  %vm632_vm2 = vcmask 261120  }
  0xc5   : > { %v550_v6 = vld [vmem:[%s462_s11] sm:$0xff]  ;;  %1514 = vmatpush3.msra.mxu1 %v631_v2  ;;  %1509 = vmatpush3.msra.mxu0 %v551_v3  ;;  %v627_v9 = vld [vmem:[%s471_s15] sm:$0xff] }
  0xc6   : > { %1515 = vmatprep.subr.mxu1 %v2010_v4  ;;  %1510 = vmatprep.mubr.msk.f32.mxu0 %vm2011_vm1, %v2010_v4 }
  0xc7   : > { %1516 = vmatpush3.msra.mxu1 %v630_v5  ;;  %1511 = vmatmul.mubr.msk.f32.vlgmr.msra.gmra.mxu0 %vm552_vm0, %v550_v6 }
  0xc8   : > { %1517 = vmatprep.subr.mxu1 %v2010_v4  ;;  %1521 = vmatprep.mubr.msk.f32.mxu1 %vm2011_vm1, %v2010_v4 }
  0xc9   : > { %1518 = vmatpush3.msra.mxu1 %v629_v7 }
  0xca   : > { %1519 = vmatprep.subr.mxu1 %v2010_v4 }
  0xcb   : > { %1520 = vmatpush3.msra.mxu1 %v628_v8 }
  0xcc   : > { %1522 = vmatmul.mubr.msk.f32.vlgmr.msra.gmra.mxu1 %vm632_vm2, %v627_v9 }
 0x187   : > { %v622_v10 = vpop.f32.mrf.mxu0 }
 0x188   : > { %626 = vst [vmem:[#allocation2] sm:$0xff] %v622_v10 }
 0x189   : > { %v1512_v11 = vpop.f32.mrf.mxu0 }
 0x18c   : > { %v702_v12 = vpop.f32.mrf.mxu1 }
 0x18d   : > { %706 = vst [vmem:[#allocation2 + $0x8] sm:$0xff] %v702_v12 }
 0x18e   : > { %v1523_v13 = vpop.f32.mrf.mxu1 }
 0x18f PF: > { %v2338_v14 = vld [vmem:[%s453_s13] sm:$0xff]  ;;  %v2012_v15 = vmov 0   ;;  %v1646_v20 = vld [vmem:[#allocation15 + $0x68] sm:$0xff]   ;;  %v1648_v22 = vld [vmem:[#allocation15 + $0x60] sm:$0xff]   ;;  %v2013_v56 = vmov 1   ;;  %v2014_v57 = vmov 2   ;;  %v708_v2 = vlaneseq }
 0x190   : > { %1636 = vset.pattern.permute.xlu0 %v2012_v15  ;;  %v1642_v16 = vld [vmem:[#allocation15 + $0x78] sm:$0xff]   ;;  %1034 = vmatprep.mubr.bf16.mxu1 %v2012_v15  ;;  %v1644_v18 = vld [vmem:[#allocation15 + $0x70] sm:$0xff]   ;;  %v1647_v21 = vld [vmem:[#allocation15 + $0x28] sm:$0xff]   ;;  %v2015_v58 = vmov 3   ;;  %s710_s26 = sld [smem:[#allocation6 + %s2111_s27]]  ;;  %s1472_s10 = sshll.u32 %s2111_s27, 7 }
 0x191   : > { %717 = vperm.xlu0 %1636, %v2338_v14   ;;  %v1643_v17 = vld [vmem:[#allocation15 + $0x38] sm:$0xff]   ;;  %1486 = vmatprep.subr.bf16.mxu0 %v1642_v16  ;;  %v1645_v19 = vld [vmem:[#allocation15 + $0x30] sm:$0xff]   ;;  %v1649_v23 = vld [vmem:[#allocation15 + $0x20] sm:$0xff]   ;;  %v709_v3 = vshrl.u32 %v708_v2, 7  ;;  %s2568_s13 = sld [smem:[#allocation38_spill]]  ;;  %s1165_s12 = sshll.u32 %s523_s22, 4  ;;  %s1166_s12 = int_to_ptr.vmem [resolvable:$true] %s1165_s12 }
 0x192   : > { %1487 = vmatpush3.bf16.msra.mxu0 %v1643_v17  ;;  %v1650_v24 = vld [vmem:[#allocation15 + $0x58] sm:$0xff]   ;;  %v1652_v26 = vld [vmem:[#allocation15 + $0x50] sm:$0xff]   ;;  %v1654_v30 = vld [vmem:[#allocation15 + $0x48] sm:$0xff]   ;;  %1637 = vset.pattern.permute.xlu1 %v2013_v56  ;;  %s1142_s15 = scalar_lea.sflag [#allocation9], %s2300_s18  ;;  %s1858_s16 = scalar_lea.vmem %s1166_s12, 128 }
 0x193   : > { %1488 = vmatprep.subr.bf16.mxu0 %v1644_v18  ;;  %v1651_v25 = vld [vmem:[#allocation15 + $0x18] sm:$0xff]   ;;  %v1653_v28 = vld [vmem:[#allocation15 + $0x10] sm:$0xff]   ;;  %v1661_v31 = vld [vmem:[#allocation16 + $0x64] ss:$8 sps:$4 sm:$0xff]   ;;  %1071 = vperm.xlu1 %1637, %v2338_v14   ;;  %p1859_p3 = scmp.ne.s32.totalorder %s1166_s12, %s1858_s16  ;;  %p2569_p6 = scmp.ne.s32.totalorder %s2546_s28, 0 }
 0x194   : > { %v1658_v27 = vld [vmem:[#allocation16 + $0x74] ss:$8 sps:$4 sm:$0xff]   ;;  %v1660_v29 = vld [vmem:[#allocation16 + $0x70] ss:$8 sps:$4 sm:$0xff]   ;;  %v1663_v32 = vld [vmem:[#allocation16 + $0x60] ss:$8 sps:$4 sm:$0xff]  }
 0x195   : > { %1002 = vmatprep.subr.bf16.mxu1 %v1658_v27  ;;  %v1664_v33 = vld [vmem:[#allocation16 + $0x54] ss:$8 sps:$4 sm:$0xff]   ;;  %v1655_v34 = vld [vmem:[#allocation15 + $0x8] sm:$0xff]   ;;  %v1656_v35 = vld [vmem:[#allocation15 + $0x40] sm:$0xff]   ;;  %p1860_p10 = pnand %p1859_p3, %p2569_p6  ;;  %s2017_s17 = smov [#allocation18]  }
 0x196   : > { %1489 = vmatpush3.bf16.msra.mxu0 %v1645_v19  ;;  %1003 = vmatpush1.bf16.msra.mxu1 %v1660_v29  ;;  %v1657_v36 = vld [vmem:[#allocation15] sm:$0xff]   ;;  %v714_v38 = vld [vmem:[#allocation2 + $0x8] sm:$0xff]  ;;  %v713_v39 = vld [vmem:[#allocation2] sm:$0xff]  ;;  %v711_v4 = vstv %s710_s26  ;;  %s1862_s5 = sshll.u32 %s2017_s17, 4  ;;  %s1863_s5 = int_to_ptr.vmem [resolvable:$false] %s1862_s5 }
 0x197   : > { %1490 = vmatprep.subr.bf16.mxu0 %v1646_v20  ;;  %1004 = vmatprep.subr.bf16.mxu1 %v1661_v31  ;;  %v1666_v45 = vld [vmem:[#allocation16 + $0x50] ss:$8 sps:$4 sm:$0xff]   ;;  %v1667_v46 = vld [vmem:[#allocation16 + $0x44] ss:$8 sps:$4 sm:$0xff]   ;;  %v1669_v47 = vld [vmem:[#allocation16 + $0x40] ss:$8 sps:$4 sm:$0xff]   ;;  %vm2348_vm3 = vcmp.lt.s32.totalorder %v709_v3, %v711_v4  ;;  %s1163_s11 = scalar_lea.hbm %s2568_s13, %s1472_s10  ;;  %p1861_p4 = pneg %p1860_p10 }
 0x198   : > { %v1670_v48 = vld [vmem:[#allocation16 + $0x34] ss:$8 sps:$4 sm:$0xff]   ;;  %v1672_v49 = vld [vmem:[#allocation16 + $0x30] ss:$8 sps:$4 sm:$0xff]   ;;  %v1673_v50 = vld [vmem:[#allocation16 + $0x24] ss:$8 sps:$4 sm:$0xff]   ;;  %1638 = vset.pattern.permute.xlu1 %v2014_v57  ;;  %p1865_p9 = scmp.lt.s32.totalorder %s1166_s12, %s1863_s5 }
 0x199   : > { %v1675_v51 = vld [vmem:[#allocation16 + $0x20] ss:$8 sps:$4 sm:$0xff]   ;;  %v1676_v52 = vld [vmem:[#allocation16 + $0x14] ss:$8 sps:$4 sm:$0xff]   ;;  %v1678_v53 = vld [vmem:[#allocation16 + $0x10] ss:$8 sps:$4 sm:$0xff]   ;;  %1088 = vperm.xlu1 %1638, %v2338_v14  }
 0x19a   : > { %1491 = vmatpush3.bf16.msra.mxu0 %v1647_v21  ;;  %1005 = vmatpush1.bf16.msra.mxu1 %v1663_v32  ;;  %v1679_v54 = vld [vmem:[#allocation16 + $0x4] ss:$8 sps:$4 sm:$0xff]   ;;  %v1681_v55 = vld [vmem:[#allocation16] ss:$8 sps:$4 sm:$0xff]   ;;  %v1425_v60 = vld [vmem:[%s2505_s6] ss:$0 sm:$0xff] }
 0x19b   : > { %1492 = vmatprep.subr.bf16.mxu0 %v1648_v22  ;;  %1006 = vmatprep.subr.bf16.mxu1 %v1664_v33  ;;  %vm1458_vm4 = vmpackc.low %vm2348_vm3, %vm2348_vm3  ;;  %v1461_v11 = vld [vmem:[%s2507_s8] ss:$0 sm:$0xff]  ;;  %v2016_v32 = vmov 4   ;;  %v1056_v33 = vand.u32 127, %v708_v2  ;;  %s1864_s26 = scalar_lea.vmem %s1863_s5, 256 }
 0x19c   : > { %v2367_v17 = vld [vmem:[%s2508_s9] ss:$0 sm:$0xff]  ;;  %1641 = vset.pattern.permute.xlu0 %v2016_v32  ;;  %p1866_p11 = scmp.lt.s32.totalorder %s1864_s26, %s1858_s16 }
 0x19d   : > { %1639 = vset.pattern.permute.xlu1 %v2015_v58  ;;  %vm1057_vm5 = vcmp.lt.s32.totalorder %v1056_v33, 6 }
 0x19e   : > { %1493 = vmatpush3.bf16.msra.mxu0 %v1649_v23  ;;  %1007 = vmatpush1.bf16.msra.mxu1 %v1666_v45  ;;  %p1867_p5 = por %p1866_p11, %p1865_p9 }
 0x19f   : > { %1494 = vmatprep.subr.bf16.mxu0 %v1650_v24  ;;  %1008 = vmatprep.subr.bf16.mxu1 %v1667_v46 }
 0x1a0   : > { %1106 = vperm.xlu1 %1639, %v2338_v14   ;;  %p1868_p2 = pnand %p1867_p5, %p1861_p4 }
 0x1a2   : > { %1495 = vmatpush3.bf16.msra.mxu0 %v1651_v25  ;;  %1009 = vmatpush1.bf16.msra.mxu1 %v1669_v47 }
 0x1a3   : > { %1496 = vmatprep.subr.bf16.mxu0 %v1652_v26  ;;  %1010 = vmatprep.subr.bf16.mxu1 %v1670_v48 }
 0x1a4   : > { %1640 = vset.pattern.permute.xlu1 %v2016_v32 }
 0x1a6   : > { %1497 = vmatpush3.bf16.msra.mxu0 %v1653_v28  ;;  %1011 = vmatpush1.bf16.msra.mxu1 %v1672_v49 }
 0x1a7   : > { %1498 = vmatprep.subr.bf16.mxu0 %v1654_v30  ;;  %1012 = vmatprep.subr.bf16.mxu1 %v1673_v50 }
 0x1aa   : > { %1499 = vmatpush3.bf16.msra.mxu0 %v1655_v34  ;;  %1013 = vmatpush1.bf16.msra.mxu1 %v1675_v51 }
 0x1ab   : > { %1500 = vmatprep.subr.bf16.mxu0 %v1656_v35  ;;  %1014 = vmatprep.subr.bf16.mxu1 %v1676_v52 }
 0x1ae   : > { %1501 = vmatpush3.bf16.msra.mxu0 %v1657_v36  ;;  %1015 = vmatpush1.bf16.msra.mxu1 %v1678_v53 }
 0x1af   : > { %1016 = vmatprep.subr.bf16.mxu1 %v1679_v54 }
 0x1b2   : > { %1017 = vmatpush1.bf16.msra.mxu1 %v1681_v55 }
 0x20c   : > { %v718_v37 = vpop.permute.xlu0 %717 }
 0x20d   : > { %1682 = vrcp.f32 %v718_v37 }
 0x20e   : > { %v1072_v9 = vpop.permute.xlu1 %1071 }
 0x214   : > { %v1089_v10 = vpop.permute.xlu1 %1088 }
 0x21a   : > { %v1683_v40 = vpop.eup %1682 }
 0x21b   : > { %v722_v41 = vmul.f32 %v1683_v40, %v714_v38  ;;  %v721_v42 = vmul.f32 %v1683_v40, %v713_v39  ;;  %v1107_v13 = vpop.permute.xlu1 %1106 }
 0x21d   : > { %v724_v43 = vpack.c.bf16 %v722_v41, %v722_v41  ;;  %v723_v44 = vpack.c.bf16 %v721_v42, %v721_v42 }
 0x21f   : > { %892 = vmatprep.mubr.bf16.mxu0 %v724_v43 }
 0x220   : > { %893 = vmatmul.mubr.bf16.vlgmr.msra.gmra.mxu0 %v723_v44 }
 0x2e0   : > { %v1502_v59 = vpop.f32.mrf.mxu0 }
 0x2e2   : > { %v1503_v61 = vpop.f32.mrf.mxu0 }
 0x2e3   : > { %v1504_v62 = vadd.f32 %v1503_v61, %v1502_v59 }
 0x2e4   : > { %v1505_v63 = vpop.f32.mrf.mxu0 }
 0x2e5   : > { %v895_v0 = vadd.f32 %v1504_v62, %v1425_v60 }
 0x2e6   : > { %v1506_v1 = vpop.f32.mrf.mxu0 }
 0x2e7   : > { %1684 = vtanh.f32 %v895_v0 }
 0x2f4   : > { %v1685_v6 = vpop.eup %1684 }
 0x2f5   : > { %v1459_v7 = vpack.c.bf16 %v1685_v6, %v1685_v6  ;;  %v903_v8 = vsel %vm2348_vm3, %v1685_v6, 0.0 }
 0x2f6   : > { %904 = vst [vmem:[%s523_s22] sm:$0xff] %v903_v8 }
 0x2f7   : > { %1460 = vmatmul.mubr.msk.bf16.vlgmr.msra.gmra.mxu1 %vm1458_vm4, %v1459_v7 }
 0x3b7   : > { %v1036_v12 = vpop.f32.mrf.mxu1 }
 0x3b8   : > { %v1050_v15 = vadd.f32 %v1461_v11, %v1036_v12 }
 0x3b9   : > { %v2362_v16 = vpop.f32.mrf.mxu1 }
 0x3ba   : > { %v1074_v18 = vmul.f32 %v1072_v9, %v2362_v16  ;;  %v1091_v19 = vmul.f32 %v1089_v10, %v2362_v16  ;;  %v1109_v20 = vmul.f32 %v1107_v13, %v2362_v16  ;;  %1051 = vadd.xlane.f32.xlu0 %v1050_v15 }
 0x3bb   : > { %v1040_v21 = vpop.f32.mrf.mxu1 }
 0x3bc   : > { %v1082_v22 = vadd.f32 %v2367_v17, %v1074_v18  ;;  %v1099_v23 = vadd.f32 %v2367_v17, %v1091_v19  ;;  %v1117_v24 = vadd.f32 %v2367_v17, %v1109_v20 }
 0x3bd   : > { %v1041_v25 = vpop.f32.mrf.mxu1 }
 0x3be   : > { %v1083_v26 = vsel %vm2348_vm3, %v1082_v22, 0.0  ;;  %v1100_v27 = vsel %vm2348_vm3, %v1099_v23, 0.0  ;;  %v1118_v28 = vsel %vm2348_vm3, %v1117_v24, 0.0 }
 0x3bf   : > { %1084 = vst [vmem:[#allocation4 + $0x8] sm:$0xff] %v1083_v26  ;;  %v1085_v29 = vpack.c.bf16 %v1083_v26, %v1083_v26  ;;  %1101 = vst [vmem:[#allocation4 + $0x10] sm:$0xff] %v1100_v27  ;;  %v1102_v30 = vpack.c.bf16 %v1100_v27, %v1100_v27  ;;  %v1120_v31 = vpack.c.bf16 %v1118_v28, %v1118_v28 }
 0x3c0   : > { %1119 = vst [vmem:[#allocation4] sm:$0xff] %v1118_v28 }
 0x3c1   : > { %1086 = vst [vmem:[%s2329_s29] sm:$0xf] %v1085_v29  ;;  %1464 = vst [vmem:[%s2329_s29 + $0x4] sm:$0xf] %v1102_v30 }
 0x3c2   : > { %1466 = vst [vmem:[%s2329_s29 + $0x8] sm:$0xf] %v1120_v31 }
 0x443   : > { %v1052_v34 = vpop.xlane.xlu0 %1051 }
 0x444   : > { %v1053_v35 = vmul.f32 0.16666667, %v1052_v34 }
 0x446   : > { %v1054_v36 = vsub.f32 %v1050_v15, %v1053_v35 }
 0x448   : > { %v1058_v37 = vsel %vm1057_vm5, %v1054_v36, 0.0 }
 0x449   : > { %v1059_v38 = vmul.f32 %v1058_v37, %v1058_v37 }
 0x44b   : > { %1060 = vadd.xlane.f32.xlu1 %v1059_v38 }
 0x45c   : > { %1124 = vperm.xlu1 %1640, %v2338_v14  }
 0x45d   : > { %1871 = shalt.err (!%p1868_p2)
}
 0x45e   : > { %s1872_s1 = scalar_lea.hbm %s1163_s11, 128  ;;  %s1876_s23 = scalar_lea.hbm %s2568_s13, 384 }
 0x45f   : > { %p1873_p7 = scmp.ne.s32.totalorder %s1163_s11, %s1872_s1  ;;  %p1877_p12 = scmp.lt.s32.totalorder %s1163_s11, %s2568_s13 }
 0x460   : > { %p1878_p13 = scmp.lt.s32.totalorder %s1876_s23, %s1872_s1 }
 0x461   : > { %p1874_p0 = pnand %p1873_p7, %p2569_p6 }
 0x462   : > { %p1879_p8 = por %p1878_p13, %p1877_p12 }
 0x463   : > { %p1875_p1 = pneg %p1874_p0 }
 0x465   : > { %p1880_p3 = pnand %p1879_p8, %p1875_p1 }
 0x467   : > { %1883 = shalt.err (!%p1880_p3)
}
 0x468   : > { %1542 = dma.vmem_to_hbm [thread:$0]  (%p2569_p6), %s1166_s12, 128, %s1163_s11, %s1142_s15  }
 0x469   : > { %s1178_s21 = sshll.u32 %s530_s30, 4  ;;  %s1478_s2 = sshll.u32 %s2111_s27, 8  ;;  %s2422_s21 = int_to_ptr.vmem [resolvable:$true] %s1178_s21 }
 0x46a   : > { %s1191_s11 = sshll.u32 %s2329_s29, 4  ;;  %s2570_s16 = sld [smem:[#allocation39_spill]]  ;;  %s2429_s11 = int_to_ptr.vmem [resolvable:$true] %s1191_s11 }
 0x46b   : > { %s2571_s1 = sld [smem:[#allocation40_spill]]  ;;  %s1147_s27 = scalar_lea.sflag [#allocation20], %s2297_s19 }
 0x470   : > { %s2420_s17 = scalar_lea.hbm %s2570_s16, %s1472_s10  ;;  %s2018_s10 = smov [#allocation19]  }
 0x471   : > { %s2427_s18 = scalar_lea.hbm %s2571_s1, %s1478_s2  ;;  %s1888_s22 = sshll.u32 %s2018_s10, 4  ;;  %s1889_s22 = int_to_ptr.vmem [resolvable:$false] %s1888_s22 }
 0x472   : > { %s1890_s23 = scalar_lea.vmem %s1889_s22, 256  ;;  %p1891_p11 = scmp.lt.s32.totalorder %s2422_s21, %s1889_s22 }
 0x4d4   : > { %v1061_v14 = vpop.xlane.xlu1 %1060 }
 0x4d5   : > { %v1062_v39 = vmul.f32 0.16666667, %v1061_v14 }
 0x4d7   : > { %v1063_v40 = vadd.f32 1e-05, %v1062_v39 }
 0x4d8   : > { %v1125_v41 = vpop.permute.xlu1 %1124 }
 0x4d9   : > { %1686 = vrsqrt.f32 %v1063_v40  ;;  %v1127_v42 = vmul.f32 %v1125_v41, %v2362_v16 }
 0x4db   : > { %v1135_v43 = vadd.f32 %v2367_v17, %v1127_v42 }
 0x4dd   : > { %v1136_v44 = vsel %vm2348_vm3, %v1135_v43, 0.0 }
 0x4de   : > { %1137 = vst [vmem:[#allocation4 + $0x18] sm:$0xff] %v1136_v44  ;;  %v1138_v45 = vpack.c.bf16 %v1136_v44, %v1136_v44 }
 0x4e0   : > { %1468 = vst [vmem:[%s2329_s29 + $0xc] sm:$0xf] %v1138_v45  ;;  %s1884_s29 = scalar_lea.vmem %s2422_s21, 128 }
 0x4e1   : > { %p1885_p10 = scmp.ne.s32.totalorder %s2422_s21, %s1884_s29  ;;  %p1892_p5 = scmp.lt.s32.totalorder %s1890_s23, %s1884_s29 }
 0x4e3   : > { %p1886_p4 = pnand %p1885_p10, %p2569_p6  ;;  %p1893_p2 = por %p1892_p5, %p1891_p11 }
 0x4e5   : > { %p1887_p9 = pneg %p1886_p4 }
 0x4e6   : > { %v1687_v46 = vpop.eup %1686 }
 0x4e7   : > { %v1065_v47 = vmul.f32 %v1687_v46, %v1058_v37  ;;  %p1894_p7 = pnand %p1893_p2, %p1887_p9 }
 0x4e9   : > { %v1066_v48 = vmax.f32 %v1065_v47, 0.0 }
 0x4eb   : > { %v1067_v49 = vsel %vm2348_vm3, %v1066_v48, 0.0 }
 0x4ec   : > { %1068 = vst [vmem:[#allocation3] sm:$0xff] %v1067_v49  ;;  %1069 = vst [vmem:[%s530_s30] sm:$0xff] %v1067_v49 }
 0x4ed   : > { %1897 = shalt.err (!%p1894_p7)
}
 0x4ee   : > { %s1898_s14 = scalar_lea.hbm %s2420_s17, 128  ;;  %s1902_s20 = scalar_lea.hbm %s2570_s16, 384 }
 0x4ef   : > { %p1899_p0 = scmp.ne.s32.totalorder %s2420_s17, %s1898_s14  ;;  %p1903_p13 = scmp.lt.s32.totalorder %s2420_s17, %s2570_s16 }
 0x4f0   : > { %p1904_p8 = scmp.lt.s32.totalorder %s1902_s20, %s1898_s14 }
 0x4f1   : > { %p1900_p1 = pnand %p1899_p0, %p2569_p6 }
 0x4f2   : > { %p1905_p3 = por %p1904_p8, %p1903_p13 }
 0x4f3   : > { %p1901_p12 = pneg %p1900_p1 }
 0x4f5   : > { %p1906_p10 = pnand %p1905_p3, %p1901_p12 }
 0x4f7   : > { %1909 = shalt.err (!%p1906_p10)
}
 0x4f8   : > { %1543 = dma.vmem_to_hbm [thread:$0]  (%p2569_p6), %s2422_s21, 128, %s2420_s17, %s1147_s27  }
 0x4f9   : > { %s1910_s15 = scalar_lea.vmem %s2429_s11, 256  ;;  %s2019_s5 = smov [#allocation21]  }
 0x4fa   : > { %p1911_p4 = scmp.ne.s32.totalorder %s2429_s11, %s1910_s15  ;;  %s1914_s26 = sshll.u32 %s2019_s5, 4  ;;  %s1915_s26 = int_to_ptr.vmem [resolvable:$false] %s1914_s26 }
 0x4fb   : > { %s1916_s29 = scalar_lea.vmem %s1915_s26, 512  ;;  %p1917_p5 = scmp.lt.s32.totalorder %s2429_s11, %s1915_s26 }
 0x4fc   : > { %p1912_p9 = pnand %p1911_p4, %p2569_p6  ;;  %p1918_p2 = scmp.lt.s32.totalorder %s1916_s29, %s1910_s15 }
 0x4fe   : > { %p1913_p11 = pneg %p1912_p9  ;;  %p1919_p7 = por %p1918_p2, %p1917_p5 }
 0x500   : > { %p1920_p0 = pnand %p1919_p7, %p1913_p11 }
 0x502   : > { %1923 = shalt.err (!%p1920_p0)
}
 0x503   : > { %s1924_s10 = scalar_lea.hbm %s2427_s18, 256  ;;  %s1928_s22 = scalar_lea.hbm %s2571_s1, 768 }
 0x504   : > { %p1925_p1 = scmp.ne.s32.totalorder %s2427_s18, %s1924_s10  ;;  %p1929_p8 = scmp.lt.s32.totalorder %s2427_s18, %s2571_s1 }
 0x505   : > { %p1930_p3 = scmp.lt.s32.totalorder %s1928_s22, %s1924_s10 }
 0x506   : > { %p1926_p12 = pnand %p1925_p1, %p2569_p6 }
 0x507   : > { %p1931_p10 = por %p1930_p3, %p1929_p8 }
 0x508   : > { %p1927_p13 = pneg %p1926_p12 }
 0x50a   : > { %p1932_p4 = pnand %p1931_p10, %p1927_p13 }
 0x50c   : > { %1935 = shalt.err (!%p1932_p4)
}
 0x50d   : > { %s2020_s30 = smov 64   ;;  %s2021_s24 = smov 4  }
 0x50e   : > { %1544 = dma.vmem_to_hbm [thread:$0]  (%p2569_p6), %s2429_s11, 256, %s2427_s18, %s1147_s27, %s2020_s30, %s2020_s30, %s2021_s24  }
 0x50f PF: > { %s2572_s20 = sld [smem:[#allocation30_spill]]  ;;  %p1585_p9 = scmp.ge.s32.totalorder %s1996_s0, 2 }
 0x510   : > { %s2573_s2 = sld [smem:[#allocation32_spill]] }
 0x515   : > { %s1206_s12 = sand.u32 1, %s2572_s20  }
 0x516   : > { %p2574_p11 = scmp.ne.s32.totalorder %s2573_s2, 0  ;;  %s1207_s15 = scalar_lea.sflag [#allocation9], %s1206_s12 }
 0x518   : > { %p1569_p5 = pnand %p1585_p9, %p2574_p11 }
 0x51a   : > { %p1570_p2 = pneg %p1569_p5 }
 0x51c   : > { %1975 = dma.done.wait (%p1570_p2), %s1207_s15, 128  }
 0x51d   : > { %1977 = vsyncadd (%p1570_p2), %s1207_s15, 4294967168  ;;  %s2575_s5 = sadd.s32 4294967294, %s1996_s0  }
 0x51e   : > { %s1215_s26 = sand.u32 1, %s2575_s5  }
 0x51f   : > { %s1216_s29 = scalar_lea.sflag [#allocation20], %s1215_s26 }
 0x520   : > { %1979 = dma.done.wait (%p1570_p2), %s1216_s29, 384  }
 0x521   : > { %1981 = vsyncadd (%p1570_p2), %s1216_s29, 4294966912  ;;  %s2576_s0 = sld [smem:[#allocation33_spill]]  ;;  %s2579_s24 = smov %s1988_s25 }
 0x522   : > { %s2577_s28 = sld [smem:[#allocation31_spill]] }
 0x523   : > { %s2578_s26 = sld [smem:[#allocation34_spill]] }
 0x527   : > { %p38_p6 = scmp.ge.s32.totalorder %s2576_s0, 5  }
 0x528   : > { %s2580_s25 = smov %s2577_s28 }
 0x529   :  { %40 = sbr.rel (!%p38_p6) target bundleno = 22 (0x16), region = 181 }
 0x52e   :  { %1230 = vsyncpa [#allocation8], 1 }
 0x52f   :  { %1232 = vsyncpa [#allocation8 + $0x1], 1 }
 0x530   :  { %1233 = vsyncpa [#allocation11], 1 }
 0x531   :  { %1235 = vsyncpa [#allocation11 + $0x1], 1 }
 0x532   :  { %1236 = vsyncpa [#allocation14], 1 }
 0x533   :  { %1238 = vsyncpa [#allocation14 + $0x1], 1 }
 0x534   :  { %1239 = vsyncpa [#allocation17], 1 }
 0x535   :  { %1240 = vsyncpa [#allocation9], 1 }
 0x536   :  { %1242 = vsyncpa [#allocation9 + $0x1], 1 }
 0x537   :  { %1243 = vsyncpa [#allocation20], 1 }
 0x538   :  { %1245 = vsyncpa [#allocation20 + $0x1], 1 }

// kernel: deconv_tree_forward.1
= control target key start
LH: loop header
LB: loop body
LE: loop exit
PB: predicated region body
PF: predicated region fallthrough
CT: control target
= control target key end

     0   :  { %s1998_s21 = smov [#allocation6]   ;;  %s2499_s0 = inlined_call_operand.hbm [shape: s32[3], index: 0, kind: input, shape index: {}]   ;;  %s2500_s1 = inlined_call_operand.hbm [shape: f32[8,128], index: 1, kind: input, shape index: {}]   ;;  %s2501_s2 = inlined_call_operand.hbm [shape: f32[3,8,128], index: 2, kind: input, shape index: {}]   ;;  %s2502_s3 = inlined_call_operand.hbm [shape: f32[3,8,8], index: 3, kind: input, shape index: {}]   ;;  %s2503_s4 = inlined_call_operand.hbm [shape: f32[3,8,32], index: 4, kind: input, shape index: {}]   ;;  %s2504_s5 = inlined_call_operand.hbm [shape: bf16[256,128], index: 5, kind: input, shape index: {}]   ;;  %s2505_s6 = inlined_call_operand.vmem [shape: f32[1,128], index: 6, kind: input, shape index: {}]   ;;  %s2506_s7 = inlined_call_operand.hbm [shape: bf16[128,256], index: 7, kind: input, shape index: {}]   ;;  %s2507_s8 = inlined_call_operand.vmem [shape: f32[1,128], index: 8, kind: input, shape index: {}]   ;;  %s2508_s9 = inlined_call_operand.vmem [shape: f32[1,128], index: 9, kind: input, shape index: {}]   ;;  %s2509_s10 = inlined_call_operand.hbm [shape: f32[3,8,128], index: 10, kind: output, shape index: {0}]   ;;  %s2510_s11 = inlined_call_operand.hbm [shape: f32[3,8,128], index: 11, kind: output, shape index: {1}]   ;;  %s2511_s12 = inlined_call_operand.hbm [shape: bf16[3,4,8,128], index: 12, kind: output, shape index: {2}]  }
   0x1   :  { %2530 = sst [smem:[#allocation35_spill]] %s2500_s1 }
   0x2   :  { %2531 = sst [smem:[#allocation36_spill]] %s2501_s2 }
   0x3   :  { %2532 = sst [smem:[#allocation37_spill]] %s2504_s5 }
   0x4   :  { %2533 = sst [smem:[#allocation38_spill]] %s2509_s10 }
   0x5   :  { %2534 = sst [smem:[#allocation39_spill]] %s2510_s11 }
   0x6   :  { %2535 = sst [smem:[#allocation40_spill]] %s2511_s12 }
   0x7   :  { %19 = dma.hbm_to_smem %s2499_s0, 16, %s1998_s21, [#allocation5] }
   0x8   :  { %1952 = dma.done.wait [#allocation5], 16 }
   0x9   :  { %1953 = vsyncadd [#allocation5], 4294967280 }
   0xa   :  { %21 = sfence }
   0xb   :  { %22 = vsyncpa [#allocation8], 0 }
   0xc   :  { %23 = vsyncpa [#allocation11], 0 }
   0xd   :  { %25 = vsyncpa [#allocation11 + $0x1], 0 }
   0xe   :  { %26 = vsyncpa [#allocation14], 0 }
   0xf   :  { %28 = vsyncpa [#allocation14 + $0x1], 0 }
  0x10   :  { %29 = vsyncpa [#allocation17], 0 }
  0x11   :  { %30 = vsyncpa [#allocation9], 0 }
  0x12   :  { %32 = vsyncpa [#allocation9 + $0x1], 0 }
  0x13   :  { %33 = vsyncpa [#allocation20], 0 }
  0x14   :  { %35 = vsyncpa [#allocation20 + $0x1], 0  ;;  %s2090_s24 = smov 0   ;;  %s2092_s25 = smov 0  }
  0x15   :  { %s2094_s26 = smov 0   ;;  %s2096_s0 = smov 0  }
  0x16 LB: > { %2536 = sst [smem:[#allocation30_spill]] %s1984_s24  ;;  %s2111_s27 = sadd.s32 4294967295, %s1996_s0   ;;  %s1996_s0 = sphi %s2096_s0, %s2576_s0   ;;  %s1992_s26 = sphi %s2094_s26, %s2578_s26   ;;  %s1988_s25 = sphi %s2092_s25, %s2580_s25   ;;  %s1984_s24 = sphi %s2090_s24, %s2579_s24  }
  0x17   : > { %2537 = sst [smem:[#allocation31_spill]] %s1992_s26  ;;  %s2512_s28 = sadd.s32 4294967294, %s1996_s0  }
  0x18   : > { %p82_p0 = scmp.ne.s32.totalorder %s1988_s25, %s1984_s24  ;;  %p2520_p1 = scmp.eq.s32.totalorder %s2111_s27, 0 }
  0x19   : > { %p263_p2 = scmp.eq.s32.totalorder %s2111_s27, 2  ;;  %p269_p3 = scmp.eq.s32.totalorder %s2512_s28, 2 }
  0x1a   : > { %p2122_p4 = por %p2520_p1, %p82_p0  ;;  %p1400_p5 = scmp.ge.s32.totalorder %s1996_s0, 1 }
  0x1b   : > { %p2127_p6 = por %p269_p3, %p82_p0  ;;  %p328_p7 = scmp.lt.s32.totalorder %s1996_s0, 4 }
  0x1c   : > { %s2538_s29 = scalar_select %p2122_p4, 1, 0 }
  0x1d   : > { %s2539_s30 = scalar_select %p2127_p6, 1, 0 }
  0x1e   : > { %p2133_p9 = pnand %p1400_p5, %p328_p7  ;;  %s1999_s14 = smov [#allocation15]  }
  0x1f   : > { %2540 = sst [smem:[#allocation32_spill]] %s2539_s30  ;;  %s351_s15 = sshll.u32 %s1999_s14, 4  ;;  %s352_s15 = int_to_ptr.vmem [resolvable:$true] %s351_s15 }
  0x20   : > { %s2541_s13 = scalar_select %p2133_p9, 1, 0 }
  0x21   : > { %p1548_p10 = pneg %p2133_p9  ;;  %s2146_s17 = sadd.s32 1, %s1996_s0  }
  0x22   : > { %2543 = sst [smem:[#allocation33_spill]] %s2146_s17  ;;  %s69_s18 = sadd.s32 1, %s1992_s26 }
  0x23   : > { %p2141_p11 = pnand %p1548_p10, %p2520_p1  ;;  %s66_s19 = ssub.s32 %s1996_s0, %s2146_s17 }
  0x24   : > { %s1707_s20 = scalar_lea.vmem %s352_s15, 2048  ;;  %p1715_p5 = scmp.lt.s32.totalorder %s352_s15, %s352_s15 }
  0x25   : > { %s2542_s16 = scalar_select %p2141_p11, 1, 0 }
  0x26   : > { %p2521_p12 = pneg %p2141_p11  ;;  %p1708_p13 = scmp.ne.s32.totalorder %s352_s15, %s1707_s20 }
  0x27   : > { %p1716_p7 = scmp.lt.s32.totalorder %s1707_s20, %s1707_s20 }
  0x28   : > { %p1710_p0 = pnand %p1708_p13, %p2521_p12 }
  0x29   : > { %p1717_p10 = por %p1716_p7, %p1715_p5 }
  0x2a   : > { %p1711_p3 = pneg %p1710_p0 }
  0x2c   : > { %p1718_p8 = pnand %p1717_p10, %p1711_p3 }
  0x2e   : > { %1721 = shalt.err (!%p1718_p8)
}
  0x2f   : > { %s2000_s21 = smov 64   ;;  %s2001_s22 = smov 4  }
  0x30   : > { %s2544_s5 = sld [smem:[#allocation37_spill]]  ;;  %p67_p13 = scmp.eq.s32.totalorder %s66_s19, 0 }
  0x31   : > { %p76_p0 = scmp.ne.s32.totalorder %s1992_s26, %s1988_s25  ;;  %p77_p8 = scmp.eq.s32.totalorder %s1996_s0, 0 }
  0x32   : > { %p1581_p3 = scmp.lt.s32.totalorder %s1996_s0, 3  ;;  %s389_s30 = sand.u32 1, %s1992_s26  }
  0x33   : > { %s2166_s20 = scalar_select %p67_p13, %s1992_s26, %s69_s18  }
  0x34   : > { %p78_p5 = por %p77_p8, %p76_p0  ;;  %p2170_p7 = por %p263_p2, %p76_p0 }
  0x35   : > { %2545 = sst [smem:[#allocation34_spill]] %s2166_s20  ;;  %s2176_s24 = sshll.u32 %s389_s30, 3 }
  0x36   : > { %1554 = dma.hbm_to_vmem [thread:$0]  (!%p2141_p11), %s2544_s5, 2048, %s352_s15, [#allocation14], %s2000_s21, %s2000_s21, %s2001_s22  }
  0x37   : > { %s2546_s28 = scalar_select %p2170_p7, 1, 0 }
  0x38   : > { %s2179_s23 = sshll.u32 %s1996_s0, 7  ;;  %s2547_s2 = sld [smem:[#allocation36_spill]] }
  0x39   : > { %s391_s18 = scalar_lea.vmem [#allocation10], %s2176_s24  ;;  %p2190_p2 = pnand %p1581_p3, %p78_p5 }
  0x3a   : > { %s398_s22 = sshll.u32 %s391_s18, 4  ;;  %s2002_s30 = smov [#allocation7]   ;;  %s2188_s22 = int_to_ptr.vmem [resolvable:$true] %s398_s22 }
  0x3b   : > { %s341_s17 = sshll.u32 %s2002_s30, 4  ;;  %s2549_s5 = sand.u32 1, %s1996_s0   ;;  %s342_s17 = int_to_ptr.vmem [resolvable:$true] %s341_s17 }
  0x3c   : > { %s2196_s20 = scalar_lea.sflag [#allocation11], %s2549_s5  ;;  %p2202_p13 = pneg %p2190_p2 }
  0x3e   : > { %s2185_s21 = scalar_lea.hbm %s2547_s2, %s2179_s23  ;;  %s1727_s12 = scalar_lea.hbm %s2547_s2, 384 }
  0x3f   : > { %s1722_s15 = scalar_lea.hbm %s2185_s21, 128  ;;  %p1728_p3 = scmp.lt.s32.totalorder %s2185_s21, %s2547_s2 }
  0x40   : > { %p1723_p10 = scmp.ne.s32.totalorder %s2185_s21, %s1722_s15  ;;  %p1729_p5 = scmp.lt.s32.totalorder %s1727_s12, %s1722_s15 }
  0x41   : > { %s2550_s19 = scalar_select %p2202_p13, 1, 0 }
  0x42   : > { %p1725_p0 = pnand %p2202_p13, %p1723_p10  ;;  %p1730_p1 = por %p1729_p5, %p1728_p3 }
  0x44   : > { %p1726_p8 = pneg %p1725_p0 }
  0x46   : > { %p1731_p12 = pnand %p1730_p1, %p1726_p8 }
  0x48   : > { %1734 = shalt.err (!%p1731_p12)
}
  0x49   : > { %s1735_s5 = scalar_lea.vmem %s2188_s22, 128  ;;  %s2003_s10 = smov [#allocation10]  }
  0x4a   : > { %p1736_p6 = scmp.ne.s32.totalorder %s2188_s22, %s1735_s5  ;;  %s1740_s26 = sshll.u32 %s2003_s10, 4  ;;  %s1741_s26 = int_to_ptr.vmem [resolvable:$false] %s1740_s26 }
  0x4b   : > { %s1742_s18 = scalar_lea.vmem %s1741_s26, 256  ;;  %p1743_p7 = scmp.lt.s32.totalorder %s2188_s22, %s1741_s26 }
  0x4c   : > { %p1738_p10 = pnand %p1736_p6, %p2202_p13  ;;  %p1744_p4 = scmp.lt.s32.totalorder %s1742_s18, %s1735_s5 }
  0x4e   : > { %p1739_p0 = pneg %p1738_p10  ;;  %p1745_p9 = por %p1744_p4, %p1743_p7 }
  0x50   : > { %p1746_p11 = pnand %p1745_p9, %p1739_p0 }
  0x52   : > { %1749 = shalt.err (!%p1746_p11)
}
  0x53   : > { %1561 = dma.hbm_to_vmem [thread:$0]  (!%p2190_p2), %s2185_s21, 128, %s2188_s22, %s2196_s20  }
  0x54   : > { %s1761_s11 = scalar_lea.vmem %s342_s17, 128  ;;  %p2551_p6 = scmp.ne.s32.totalorder %s2542_s16, 0 }
  0x55   : > { %p1762_p1 = scmp.ne.s32.totalorder %s342_s17, %s1761_s11  ;;  %p1769_p5 = scmp.lt.s32.totalorder %s342_s17, %s342_s17 }
  0x56   : > { %p2552_p12 = pneg %p2551_p6  ;;  %p1770_p10 = scmp.lt.s32.totalorder %s1761_s11, %s1761_s11 }
  0x58   : > { %p1764_p8 = pnand %p1762_p1, %p2552_p12  ;;  %p1771_p13 = por %p1770_p10, %p1769_p5 }
  0x5a   : > { %p1765_p3 = pneg %p1764_p8 }
  0x5c   : > { %p1772_p4 = pnand %p1771_p13, %p1765_p3 }
  0x5e   : > { %1775 = shalt.err (!%p1772_p4)
}
  0x5f   : > { %s2553_s1 = sld [smem:[#allocation35_spill]]  ;;  %s2004_s21 = smov [#allocation16]  }
  0x60   : > { %s367_s22 = sshll.u32 %s2004_s21, 4  ;;  %p2554_p11 = pmov %p2552_p12  ;;  %s368_s22 = int_to_ptr.vmem [resolvable:$true] %s367_s22 }
  0x61   : > { %s1787_s15 = scalar_lea.vmem %s368_s22, 2048  ;;  %p1795_p1 = scmp.lt.s32.totalorder %s368_s22, %s368_s22 }
  0x62   : > { %p1788_p9 = scmp.ne.s32.totalorder %s368_s22, %s1787_s15  ;;  %p1796_p12 = scmp.lt.s32.totalorder %s1787_s15, %s1787_s15 }
  0x64   : > { %p1790_p7 = pnand %p1788_p9, %p2554_p11  ;;  %p1797_p13 = por %p1796_p12, %p1795_p1 }
  0x65   : > { %1551 = dma.hbm_to_vmem [thread:$0]  (!%p2551_p6), %s2553_s1, 128, %s342_s17, [#allocation8]  }
  0x66   : > { %p1791_p0 = pneg %p1790_p7 }
  0x68   : > { %p1798_p8 = pnand %p1797_p13, %p1791_p0 }
  0x6a   : > { %1801 = shalt.err (!%p1798_p8)
}
  0x6b   : > { %s2005_s30 = smov 128   ;;  %s2006_s17 = smov 8  }
  0x6c   : > { %1557 = dma.hbm_to_vmem [thread:$0]  (!%p2551_p6), %s2506_s7, 2048, %s368_s22, [#allocation17], %s2005_s30, %s2005_s30, %s2006_s17  }
  0x6d   : > { %s2245_s10 = scalar_lea.hbm %s2502_s3, %s2179_s23  ;;  %s409_s12 = scalar_lea.vmem [#allocation12], %s2176_s24 }
  0x6e   : > { %s416_s21 = sshll.u32 %s409_s12, 4  ;;  %s2252_s2 = scalar_lea.hbm %s2503_s4, %s2179_s23  ;;  %s417_s21 = int_to_ptr.vmem [resolvable:$true] %s416_s21 }
  0x6f   : > { %s1802_s16 = scalar_lea.hbm %s2245_s10, 128  ;;  %p2555_p5 = scmp.ne.s32.totalorder %s2550_s19, 0 }
  0x70   : > { %p1803_p3 = scmp.ne.s32.totalorder %s2245_s10, %s1802_s16  ;;  %s1807_s17 = scalar_lea.hbm %s2502_s3, 384 }
  0x71   : > { %p1808_p4 = scmp.lt.s32.totalorder %s2245_s10, %s2502_s3  ;;  %p1809_p9 = scmp.lt.s32.totalorder %s1807_s17, %s1802_s16 }
  0x72   : > { %p1805_p6 = pnand %p1803_p3, %p2555_p5 }
  0x73   : > { %p1810_p11 = por %p1809_p9, %p1808_p4 }
  0x74   : > { %p1806_p10 = pneg %p1805_p6 }
  0x76   : > { %p1811_p7 = pnand %p1810_p11, %p1806_p10 }
  0x78   : > { %1814 = shalt.err (!%p1811_p7)
}
  0x79   : > { %s1815_s1 = scalar_lea.vmem %s417_s21, 128  ;;  %s2007_s23 = smov [#allocation12]  }
  0x7a   : > { %p1816_p0 = scmp.ne.s32.totalorder %s417_s21, %s1815_s1  ;;  %s1820_s18 = sshll.u32 %s2007_s23, 4  ;;  %s1821_s18 = int_to_ptr.vmem [resolvable:$false] %s1820_s18 }
  0x7b   : > { %s1822_s11 = scalar_lea.vmem %s1821_s18, 256  ;;  %p1823_p13 = scmp.lt.s32.totalorder %s417_s21, %s1821_s18 }
  0x7c   : > { %p1818_p1 = pnand %p1816_p0, %p2555_p5  ;;  %p1824_p8 = scmp.lt.s32.totalorder %s1822_s11, %s1815_s1 }
  0x7e   : > { %p1819_p12 = pneg %p1818_p1  ;;  %p1825_p3 = por %p1824_p8, %p1823_p13 }
  0x80   : > { %p1826_p6 = pnand %p1825_p3, %p1819_p12 }
  0x82   : > { %1829 = shalt.err (!%p1826_p6)
}
  0x83   : > { %1564 = dma.hbm_to_vmem [thread:$0]  (!%p2190_p2), %s2245_s10, 128, %s417_s21, %s2196_s20  }
  0x84   : > { %s427_s12 = scalar_lea.vmem [#allocation13], %s2176_s24  ;;  %s2556_s16 = sand.u32 1, %s1996_s0  }
  0x85   : > { %s434_s15 = sshll.u32 %s427_s12, 4  ;;  %s424_s22 = scalar_lea.sflag [#allocation14], %s2556_s16  ;;  %s435_s15 = int_to_ptr.vmem [resolvable:$true] %s434_s15 }
  0x86   : > { %s1830_s30 = scalar_lea.hbm %s2252_s2, 128  ;;  %s1835_s26 = scalar_lea.hbm %s2503_s4, 384 }
  0x87   : > { %p1831_p10 = scmp.ne.s32.totalorder %s2252_s2, %s1830_s30  ;;  %p1836_p11 = scmp.lt.s32.totalorder %s2252_s2, %s2503_s4 }
  0x88   : > { %p1837_p7 = scmp.lt.s32.totalorder %s1835_s26, %s1830_s30 }
  0x89   : > { %p1833_p4 = pnand %p1831_p10, %p2555_p5 }
  0x8a   : > { %p1838_p0 = por %p1837_p7, %p1836_p11 }
  0x8b   : > { %p1834_p9 = pneg %p1833_p4 }
  0x8d   : > { %p1839_p1 = pnand %p1838_p0, %p1834_p9 }
  0x8f   : > { %1842 = shalt.err (!%p1839_p1)
}
  0x90   : > { %s1843_s24 = scalar_lea.vmem %s435_s15, 128  ;;  %s2008_s20 = smov [#allocation13]  }
  0x91   : > { %p1844_p12 = scmp.ne.s32.totalorder %s435_s15, %s1843_s24  ;;  %s1848_s10 = sshll.u32 %s2008_s20, 4  ;;  %s1849_s10 = int_to_ptr.vmem [resolvable:$false] %s1848_s10 }
  0x92   : > { %s1850_s21 = scalar_lea.vmem %s1849_s10, 256  ;;  %p1851_p3 = scmp.lt.s32.totalorder %s435_s15, %s1849_s10 }
  0x93   : > { %p1846_p13 = pnand %p1844_p12, %p2555_p5  ;;  %p1852_p6 = scmp.lt.s32.totalorder %s1850_s21, %s1843_s24 }
  0x95   : > { %p1847_p8 = pneg %p1846_p13  ;;  %p1853_p10 = por %p1852_p6, %p1851_p3 }
  0x97   : > { %p1854_p4 = pnand %p1853_p10, %p1847_p8 }
  0x99   : > { %1857 = shalt.err (!%p1854_p4)
}
  0x9a   : > { %1567 = dma.hbm_to_vmem [thread:$0]  (!%p2190_p2), %s2252_s2, 128, %s435_s15, %s424_s22  }
  0x9b   : > { %p2557_p9 = scmp.ne.s32.totalorder %s2541_s13, 0 }
  0x9c   : > { %p2558_p11 = scmp.eq.s32.totalorder (!%p2557_p9), %s2111_s27, 0 }
  0x9d   : > { %443 = sbr.rel (%p2557_p9) target bundleno = 1295 (0x50f), region = 56 }
  0xa2   : > { %1955 = dma.done.wait (%p2558_p11), [#allocation8], 128   ;;  %p2559_p5 = pmov %p2558_p11 }
  0xa3   : > { %s2297_s19 = sand.u32 1, %s2111_s27   ;;  %s2300_s18 = sand.u32 1, %s1988_s25  }
  0xa4   : > { %1957 = vsyncadd (%p2559_p5), [#allocation8], 4294967168  ;;  %s2303_s14 = sshll.u32 %s2300_s18, 3  ;;  %s450_s2 = scalar_lea.sflag [#allocation11], %s2297_s19 }
  0xa5   : > { %s453_s13 = scalar_lea.vmem [#allocation10], %s2303_s14  ;;  %p2560_p2 = scmp.ne.s32.totalorder %s2538_s29, 0 }
  0xa7   : > { %1959 = dma.done.wait (%p2560_p2), %s450_s2, 256  }
  0xa8   : > { %1961 = vsyncadd (%p2560_p2), %s450_s2, 4294967040  ;;  %s462_s11 = scalar_lea.vmem [#allocation12], %s2303_s14  ;;  %s468_s12 = scalar_lea.sflag [#allocation14], %s2297_s19 }
  0xa9   : > { %s471_s15 = scalar_lea.vmem [#allocation13], %s2303_s14 }
  0xaa   : > { %1963 = dma.done.wait (%p2560_p2), %s468_s12, 128  }
  0xab   : > { %1965 = vsyncadd (%p2560_p2), %s468_s12, 4294967168  ;;  %p2561_p7 = pmov %p2559_p5 }
  0xac   : > { %p2562_p0 = pmov %p2559_p5 }
  0xad   : > { %1967 = dma.done.wait (%p2561_p7), [#allocation14], 2048  }
  0xae   : > { %1969 = vsyncadd (%p2562_p0), [#allocation14], 4294965248  ;;  %p2563_p1 = pmov %p2562_p0 }
  0xaf   : > { %p2564_p12 = pmov %p2562_p0 }
  0xb0   : > { %1971 = dma.done.wait (%p2563_p1), [#allocation17], 2048  }
  0xb1   : > { %1973 = vsyncadd (%p2564_p12), [#allocation17], 4294965248  ;;  %s1420_s16 = sshll.u32 %s2300_s18, 4  ;;  %s523_s22 = scalar_lea.vmem [#allocation18], %s2303_s14 }
  0xb2   : > { %s530_s30 = scalar_lea.vmem [#allocation19], %s2303_s14  ;;  %s2329_s29 = scalar_lea.vmem [#allocation21], %s1420_s16 }
  0xb3   : > { %p2565_p13 = scmp.ne.s32.totalorder %s2111_s27, 0 }
  0xb5   : > { %542 = sbr.rel (%p2565_p13) target bundleno = 188 (0xbc), region = 84 }
  0xba   : > { %v544_v0 = vld [vmem:[#allocation7] sm:$0xff]  ;;  %v2009_v1 = vmov 0.0  }
  0xbb   : > { %543 = vst [vmem:[#allocation2] sm:$0xff] %v2009_v1  ;;  %545 = vst [vmem:[#allocation2 + $0x8] sm:$0xff] %v544_v0 }
  0xbc PF: > { %p1422_p8 = scmp.le.s32.totalorder %s2111_s27, 0 }
  0xbe   : > { %549 = sbr.rel (%p1422_p8) target bundleno = 399 (0x18f), region = 88 }
  0xc3   : > { %v631_v2 = vld [vmem:[#allocation4 + $0x18] sm:$0xff]  ;;  %v2010_v4 = vmov 0.0   ;;  %v630_v5 = vld [vmem:[#allocation4] sm:$0xff]  ;;  %vm552_vm0 = vcmask 64512   ;;  %vm2011_vm1 = vmmov 0   ;;  %v629_v7 = vld [vmem:[#allocation4 + $0x10] sm:$0xff] }
  0xc4   : > { %v551_v3 = vld [vmem:[#allocation3] sm:$0xff]  ;;  %1513 = vmatprep.subr.mxu1 %v2010_v4  ;;  %1508 = vmatprep.subr.mxu0 %v2010_v4  ;;  %v628_v8 = vld [vmem:[#allocation4 + $0x8] sm:$0xff]  ;;  %vm632_vm2 = vcmask 261120  }
  0xc5   : > { %v550_v6 = vld [vmem:[%s462_s11] sm:$0xff]  ;;  %1514 = vmatpush3.msra.mxu1 %v631_v2  ;;  %1509 = vmatpush3.msra.mxu0 %v551_v3  ;;  %v627_v9 = vld [vmem:[%s471_s15] sm:$0xff] }
  0xc6   : > { %1515 = vmatprep.subr.mxu1 %v2010_v4  ;;  %1510 = vmatprep.mubr.msk.f32.mxu0 %vm2011_vm1, %v2010_v4 }
  0xc7   : > { %1516 = vmatpush3.msra.mxu1 %v630_v5  ;;  %1511 = vmatmul.mubr.msk.f32.vlgmr.msra.gmra.mxu0 %vm552_vm0, %v550_v6 }
  0xc8   : > { %1517 = vmatprep.subr.mxu1 %v2010_v4  ;;  %1521 = vmatprep.mubr.msk.f32.mxu1 %vm2011_vm1, %v2010_v4 }
  0xc9   : > { %1518 = vmatpush3.msra.mxu1 %v629_v7 }
  0xca   : > { %1519 = vmatprep.subr.mxu1 %v2010_v4 }
  0xcb   : > { %1520 = vmatpush3.msra.mxu1 %v628_v8 }
  0xcc   : > { %1522 = vmatmul.mubr.msk.f32.vlgmr.msra.gmra.mxu1 %vm632_vm2, %v627_v9 }
 0x187   : > { %v622_v10 = vpop.f32.mrf.mxu0 }
 0x188   : > { %626 = vst [vmem:[#allocation2] sm:$0xff] %v622_v10 }
 0x189   : > { %v1512_v11 = vpop.f32.mrf.mxu0 }
 0x18c   : > { %v702_v12 = vpop.f32.mrf.mxu1 }
 0x18d   : > { %706 = vst [vmem:[#allocation2 + $0x8] sm:$0xff] %v702_v12 }
 0x18e   : > { %v1523_v13 = vpop.f32.mrf.mxu1 }
 0x18f PF: > { %v2338_v14 = vld [vmem:[%s453_s13] sm:$0xff]  ;;  %v2012_v15 = vmov 0   ;;  %v1646_v20 = vld [vmem:[#allocation15 + $0x68] sm:$0xff]   ;;  %v1648_v22 = vld [vmem:[#allocation15 + $0x60] sm:$0xff]   ;;  %v2013_v56 = vmov 1   ;;  %v2014_v57 = vmov 2   ;;  %v708_v2 = vlaneseq }
 0x190   : > { %1636 = vset.pattern.permute.xlu0 %v2012_v15  ;;  %v1642_v16 = vld [vmem:[#allocation15 + $0x78] sm:$0xff]   ;;  %1034 = vmatprep.mubr.bf16.mxu1 %v2012_v15  ;;  %v1644_v18 = vld [vmem:[#allocation15 + $0x70] sm:$0xff]   ;;  %v1647_v21 = vld [vmem:[#allocation15 + $0x28] sm:$0xff]   ;;  %v2015_v58 = vmov 3   ;;  %s710_s26 = sld [smem:[#allocation6 + %s2111_s27]]  ;;  %s1472_s10 = sshll.u32 %s2111_s27, 7 }
 0x191   : > { %717 = vperm.xlu0 %1636, %v2338_v14   ;;  %v1643_v17 = vld [vmem:[#allocation15 + $0x38] sm:$0xff]   ;;  %1486 = vmatprep.subr.bf16.mxu0 %v1642_v16  ;;  %v1645_v19 = vld [vmem:[#allocation15 + $0x30] sm:$0xff]   ;;  %v1649_v23 = vld [vmem:[#allocation15 + $0x20] sm:$0xff]   ;;  %v709_v3 = vshrl.u32 %v708_v2, 7  ;;  %s2568_s13 = sld [smem:[#allocation38_spill]]  ;;  %s1165_s12 = sshll.u32 %s523_s22, 4  ;;  %s1166_s12 = int_to_ptr.vmem [resolvable:$true] %s1165_s12 }
 0x192   : > { %1487 = vmatpush3.bf16.msra.mxu0 %v1643_v17  ;;  %v1650_v24 = vld [vmem:[#allocation15 + $0x58] sm:$0xff]   ;;  %v1652_v26 = vld [vmem:[#allocation15 + $0x50] sm:$0xff]   ;;  %v1654_v30 = vld [vmem:[#allocation15 + $0x48] sm:$0xff]   ;;  %1637 = vset.pattern.permute.xlu1 %v2013_v56  ;;  %s1142_s15 = scalar_lea.sflag [#allocation9], %s2300_s18  ;;  %s1858_s16 = scalar_lea.vmem %s1166_s12, 128 }
 0x193   : > { %1488 = vmatprep.subr.bf16.mxu0 %v1644_v18  ;;  %v1651_v25 = vld [vmem:[#allocation15 + $0x18] sm:$0xff]   ;;  %v1653_v28 = vld [vmem:[#allocation15 + $0x10] sm:$0xff]   ;;  %v1661_v31 = vld [vmem:[#allocation16 + $0x64] ss:$8 sps:$4 sm:$0xff]   ;;  %1071 = vperm.xlu1 %1637, %v2338_v14   ;;  %p1859_p3 = scmp.ne.s32.totalorder %s1166_s12, %s1858_s16  ;;  %p2569_p6 = scmp.ne.s32.totalorder %s2546_s28, 0 }
 0x194   : > { %v1658_v27 = vld [vmem:[#allocation16 + $0x74] ss:$8 sps:$4 sm:$0xff]   ;;  %v1660_v29 = vld [vmem:[#allocation16 + $0x70] ss:$8 sps:$4 sm:$0xff]   ;;  %v1663_v32 = vld [vmem:[#allocation16 + $0x60] ss:$8 sps:$4 sm:$0xff]  }
 0x195   : > { %1002 = vmatprep.subr.bf16.mxu1 %v1658_v27  ;;  %v1664_v33 = vld [vmem:[#allocation16 + $0x54] ss:$8 sps:$4 sm:$0xff]   ;;  %v1655_v34 = vld [vmem:[#allocation15 + $0x8] sm:$0xff]   ;;  %v1656_v35 = vld [vmem:[#allocation15 + $0x40] sm:$0xff]   ;;  %p1860_p10 = pnand %p1859_p3, %p2569_p6  ;;  %s2017_s17 = smov [#allocation18]  }
 0x196   : > { %1489 = vmatpush3.bf16.msra.mxu0 %v1645_v19  ;;  %1003 = vmatpush1.bf16.msra.mxu1 %v1660_v29  ;;  %v1657_v36 = vld [vmem:[#allocation15] sm:$0xff]   ;;  %v714_v38 = vld [vmem:[#allocation2 + $0x8] sm:$0xff]  ;;  %v713_v39 = vld [vmem:[#allocation2] sm:$0xff]  ;;  %v711_v4 = vstv %s710_s26  ;;  %s1862_s5 = sshll.u32 %s2017_s17, 4  ;;  %s1863_s5 = int_to_ptr.vmem [resolvable:$false] %s1862_s5 }
 0x197   : > { %1490 = vmatprep.subr.bf16.mxu0 %v1646_v20  ;;  %1004 = vmatprep.subr.bf16.mxu1 %v1661_v31  ;;  %v1666_v45 = vld [vmem:[#allocation16 + $0x50] ss:$8 sps:$4 sm:$0xff]   ;;  %v1667_v46 = vld [vmem:[#allocation16 + $0x44] ss:$8 sps:$4 sm:$0xff]   ;;  %v1669_v47 = vld [vmem:[#allocation16 + $0x40] ss:$8 sps:$4 sm:$0xff]   ;;  %vm2348_vm3 = vcmp.lt.s32.totalorder %v709_v3, %v711_v4  ;;  %s1163_s11 = scalar_lea.hbm %s2568_s13, %s1472_s10  ;;  %p1861_p4 = pneg %p1860_p10 }
 0x198   : > { %v1670_v48 = vld [vmem:[#allocation16 + $0x34] ss:$8 sps:$4 sm:$0xff]   ;;  %v1672_v49 = vld [vmem:[#allocation16 + $0x30] ss:$8 sps:$4 sm:$0xff]   ;;  %v1673_v50 = vld [vmem:[#allocation16 + $0x24] ss:$8 sps:$4 sm:$0xff]   ;;  %1638 = vset.pattern.permute.xlu1 %v2014_v57  ;;  %p1865_p9 = scmp.lt.s32.totalorder %s1166_s12, %s1863_s5 }
 0x199   : > { %v1675_v51 = vld [vmem:[#allocation16 + $0x20] ss:$8 sps:$4 sm:$0xff]   ;;  %v1676_v52 = vld [vmem:[#allocation16 + $0x14] ss:$8 sps:$4 sm:$0xff]   ;;  %v1678_v53 = vld [vmem:[#allocation16 + $0x10] ss:$8 sps:$4 sm:$0xff]   ;;  %1088 = vperm.xlu1 %1638, %v2338_v14  }
 0x19a   : > { %1491 = vmatpush3.bf16.msra.mxu0 %v1647_v21  ;;  %1005 = vmatpush1.bf16.msra.mxu1 %v1663_v32  ;;  %v1679_v54 = vld [vmem:[#allocation16 + $0x4] ss:$8 sps:$4 sm:$0xff]   ;;  %v1681_v55 = vld [vmem:[#allocation16] ss:$8 sps:$4 sm:$0xff]   ;;  %v1425_v60 = vld [vmem:[%s2505_s6] ss:$0 sm:$0xff] }
 0x19b   : > { %1492 = vmatprep.subr.bf16.mxu0 %v1648_v22  ;;  %1006 = vmatprep.subr.bf16.mxu1 %v1664_v33  ;;  %vm1458_vm4 = vmpackc.low %vm2348_vm3, %vm2348_vm3  ;;  %v1461_v11 = vld [vmem:[%s2507_s8] ss:$0 sm:$0xff]  ;;  %v2016_v32 = vmov 4   ;;  %v1056_v33 = vand.u32 127, %v708_v2  ;;  %s1864_s26 = scalar_lea.vmem %s1863_s5, 256 }
 0x19c   : > { %v2367_v17 = vld [vmem:[%s2508_s9] ss:$0 sm:$0xff]  ;;  %1641 = vset.pattern.permute.xlu0 %v2016_v32  ;;  %p1866_p11 = scmp.lt.s32.totalorder %s1864_s26, %s1858_s16 }
 0x19d   : > { %1639 = vset.pattern.permute.xlu1 %v2015_v58  ;;  %vm1057_vm5 = vcmp.lt.s32.totalorder %v1056_v33, 6 }
 0x19e   : > { %1493 = vmatpush3.bf16.msra.mxu0 %v1649_v23  ;;  %1007 = vmatpush1.bf16.msra.mxu1 %v1666_v45  ;;  %p1867_p5 = por %p1866_p11, %p1865_p9 }
 0x19f   : > { %1494 = vmatprep.subr.bf16.mxu0 %v1650_v24  ;;  %1008 = vmatprep.subr.bf16.mxu1 %v1667_v46 }
 0x1a0   : > { %1106 = vperm.xlu1 %1639, %v2338_v14   ;;  %p1868_p2 = pnand %p1867_p5, %p1861_p4 }
 0x1a2   : > { %1495 = vmatpush3.bf16.msra.mxu0 %v1651_v25  ;;  %1009 = vmatpush1.bf16.msra.mxu1 %v1669_v47 }
 0x1a3   : > { %1496 = vmatprep.subr.bf16.mxu0 %v1652_v26  ;;  %1010 = vmatprep.subr.bf16.mxu1 %v1670_v48 }
 0x1a4   : > { %1640 = vset.pattern.permute.xlu1 %v2016_v32 }
 0x1a6   : > { %1497 = vmatpush3.bf16.msra.mxu0 %v1653_v28  ;;  %1011 = vmatpush1.bf16.msra.mxu1 %v1672_v49 }
 0x1a7   : > { %1498 = vmatprep.subr.bf16.mxu0 %v1654_v30  ;;  %1012 = vmatprep.subr.bf16.mxu1 %v1673_v50 }
 0x1aa   : > { %1499 = vmatpush3.bf16.msra.mxu0 %v1655_v34  ;;  %1013 = vmatpush1.bf16.msra.mxu1 %v1675_v51 }
 0x1ab   : > { %1500 = vmatprep.subr.bf16.mxu0 %v1656_v35  ;;  %1014 = vmatprep.subr.bf16.mxu1 %v1676_v52 }
 0x1ae   : > { %1501 = vmatpush3.bf16.msra.mxu0 %v1657_v36  ;;  %1015 = vmatpush1.bf16.msra.mxu1 %v1678_v53 }
 0x1af   : > { %1016 = vmatprep.subr.bf16.mxu1 %v1679_v54 }
 0x1b2   : > { %1017 = vmatpush1.bf16.msra.mxu1 %v1681_v55 }
 0x20c   : > { %v718_v37 = vpop.permute.xlu0 %717 }
 0x20d   : > { %1682 = vrcp.f32 %v718_v37 }
 0x20e   : > { %v1072_v9 = vpop.permute.xlu1 %1071 }
 0x214   : > { %v1089_v10 = vpop.permute.xlu1 %1088 }
 0x21a   : > { %v1683_v40 = vpop.eup %1682 }
 0x21b   : > { %v722_v41 = vmul.f32 %v1683_v40, %v714_v38  ;;  %v721_v42 = vmul.f32 %v1683_v40, %v713_v39  ;;  %v1107_v13 = vpop.permute.xlu1 %1106 }
 0x21d   : > { %v724_v43 = vpack.c.bf16 %v722_v41, %v722_v41  ;;  %v723_v44 = vpack.c.bf16 %v721_v42, %v721_v42 }
 0x21f   : > { %892 = vmatprep.mubr.bf16.mxu0 %v724_v43 }
 0x220   : > { %893 = vmatmul.mubr.bf16.vlgmr.msra.gmra.mxu0 %v723_v44 }
 0x2e0   : > { %v1502_v59 = vpop.f32.mrf.mxu0 }
 0x2e2   : > { %v1503_v61 = vpop.f32.mrf.mxu0 }
 0x2e3   : > { %v1504_v62 = vadd.f32 %v1503_v61, %v1502_v59 }
 0x2e4   : > { %v1505_v63 = vpop.f32.mrf.mxu0 }
 0x2e5   : > { %v895_v0 = vadd.f32 %v1504_v62, %v1425_v60 }
 0x2e6   : > { %v1506_v1 = vpop.f32.mrf.mxu0 }
 0x2e7   : > { %1684 = vtanh.f32 %v895_v0 }
 0x2f4   : > { %v1685_v6 = vpop.eup %1684 }
 0x2f5   : > { %v1459_v7 = vpack.c.bf16 %v1685_v6, %v1685_v6  ;;  %v903_v8 = vsel %vm2348_vm3, %v1685_v6, 0.0 }
 0x2f6   : > { %904 = vst [vmem:[%s523_s22] sm:$0xff] %v903_v8 }
 0x2f7   : > { %1460 = vmatmul.mubr.msk.bf16.vlgmr.msra.gmra.mxu1 %vm1458_vm4, %v1459_v7 }
 0x3b7   : > { %v1036_v12 = vpop.f32.mrf.mxu1 }
 0x3b8   : > { %v1050_v15 = vadd.f32 %v1461_v11, %v1036_v12 }
 0x3b9   : > { %v2362_v16 = vpop.f32.mrf.mxu1 }
 0x3ba   : > { %v1074_v18 = vmul.f32 %v1072_v9, %v2362_v16  ;;  %v1091_v19 = vmul.f32 %v1089_v10, %v2362_v16  ;;  %v1109_v20 = vmul.f32 %v1107_v13, %v2362_v16  ;;  %1051 = vadd.xlane.f32.xlu0 %v1050_v15 }
 0x3bb   : > { %v1040_v21 = vpop.f32.mrf.mxu1 }
 0x3bc   : > { %v1082_v22 = vadd.f32 %v2367_v17, %v1074_v18  ;;  %v1099_v23 = vadd.f32 %v2367_v17, %v1091_v19  ;;  %v1117_v24 = vadd.f32 %v2367_v17, %v1109_v20 }
 0x3bd   : > { %v1041_v25 = vpop.f32.mrf.mxu1 }
 0x3be   : > { %v1083_v26 = vsel %vm2348_vm3, %v1082_v22, 0.0  ;;  %v1100_v27 = vsel %vm2348_vm3, %v1099_v23, 0.0  ;;  %v1118_v28 = vsel %vm2348_vm3, %v1117_v24, 0.0 }
 0x3bf   : > { %1084 = vst [vmem:[#allocation4 + $0x8] sm:$0xff] %v1083_v26  ;;  %v1085_v29 = vpack.c.bf16 %v1083_v26, %v1083_v26  ;;  %1101 = vst [vmem:[#allocation4 + $0x10] sm:$0xff] %v1100_v27  ;;  %v1102_v30 = vpack.c.bf16 %v1100_v27, %v1100_v27  ;;  %v1120_v31 = vpack.c.bf16 %v1118_v28, %v1118_v28 }
 0x3c0   : > { %1119 = vst [vmem:[#allocation4] sm:$0xff] %v1118_v28 }
 0x3c1   : > { %1086 = vst [vmem:[%s2329_s29] sm:$0xf] %v1085_v29  ;;  %1464 = vst [vmem:[%s2329_s29 + $0x4] sm:$0xf] %v1102_v30 }
 0x3c2   : > { %1466 = vst [vmem:[%s2329_s29 + $0x8] sm:$0xf] %v1120_v31 }
 0x443   : > { %v1052_v34 = vpop.xlane.xlu0 %1051 }
 0x444   : > { %v1053_v35 = vmul.f32 0.16666667, %v1052_v34 }
 0x446   : > { %v1054_v36 = vsub.f32 %v1050_v15, %v1053_v35 }
 0x448   : > { %v1058_v37 = vsel %vm1057_vm5, %v1054_v36, 0.0 }
 0x449   : > { %v1059_v38 = vmul.f32 %v1058_v37, %v1058_v37 }
 0x44b   : > { %1060 = vadd.xlane.f32.xlu1 %v1059_v38 }
 0x45c   : > { %1124 = vperm.xlu1 %1640, %v2338_v14  }
 0x45d   : > { %1871 = shalt.err (!%p1868_p2)
}
 0x45e   : > { %s1872_s1 = scalar_lea.hbm %s1163_s11, 128  ;;  %s1876_s23 = scalar_lea.hbm %s2568_s13, 384 }
 0x45f   : > { %p1873_p7 = scmp.ne.s32.totalorder %s1163_s11, %s1872_s1  ;;  %p1877_p12 = scmp.lt.s32.totalorder %s1163_s11, %s2568_s13 }
 0x460   : > { %p1878_p13 = scmp.lt.s32.totalorder %s1876_s23, %s1872_s1 }
 0x461   : > { %p1874_p0 = pnand %p1873_p7, %p2569_p6 }
 0x462   : > { %p1879_p8 = por %p1878_p13, %p1877_p12 }
 0x463   : > { %p1875_p1 = pneg %p1874_p0 }
 0x465   : > { %p1880_p3 = pnand %p1879_p8, %p1875_p1 }
 0x467   : > { %1883 = shalt.err (!%p1880_p3)
}
 0x468   : > { %1542 = dma.vmem_to_hbm [thread:$0]  (%p2569_p6), %s1166_s12, 128, %s1163_s11, %s1142_s15  }
 0x469   : > { %s1178_s21 = sshll.u32 %s530_s30, 4  ;;  %s1478_s2 = sshll.u32 %s2111_s27, 8  ;;  %s2422_s21 = int_to_ptr.vmem [resolvable:$true] %s1178_s21 }
 0x46a   : > { %s1191_s11 = sshll.u32 %s2329_s29, 4  ;;  %s2570_s16 = sld [smem:[#allocation39_spill]]  ;;  %s2429_s11 = int_to_ptr.vmem [resolvable:$true] %s1191_s11 }
 0x46b   : > { %s2571_s1 = sld [smem:[#allocation40_spill]]  ;;  %s1147_s27 = scalar_lea.sflag [#allocation20], %s2297_s19 }
 0x470   : > { %s2420_s17 = scalar_lea.hbm %s2570_s16, %s1472_s10  ;;  %s2018_s10 = smov [#allocation19]  }
 0x471   : > { %s2427_s18 = scalar_lea.hbm %s2571_s1, %s1478_s2  ;;  %s1888_s22 = sshll.u32 %s2018_s10, 4  ;;  %s1889_s22 = int_to_ptr.vmem [resolvable:$false] %s1888_s22 }
 0x472   : > { %s1890_s23 = scalar_lea.vmem %s1889_s22, 256  ;;  %p1891_p11 = scmp.lt.s32.totalorder %s2422_s21, %s1889_s22 }
 0x4d4   : > { %v1061_v14 = vpop.xlane.xlu1 %1060 }
 0x4d5   : > { %v1062_v39 = vmul.f32 0.16666667, %v1061_v14 }
 0x4d7   : > { %v1063_v40 = vadd.f32 1e-05, %v1062_v39 }
 0x4d8   : > { %v1125_v41 = vpop.permute.xlu1 %1124 }
 0x4d9   : > { %1686 = vrsqrt.f32 %v1063_v40  ;;  %v1127_v42 = vmul.f32 %v1125_v41, %v2362_v16 }
 0x4db   : > { %v1135_v43 = vadd.f32 %v2367_v17, %v1127_v42 }
 0x4dd   : > { %v1136_v44 = vsel %vm2348_vm3, %v1135_v43, 0.0 }
 0x4de   : > { %1137 = vst [vmem:[#allocation4 + $0x18] sm:$0xff] %v1136_v44  ;;  %v1138_v45 = vpack.c.bf16 %v1136_v44, %v1136_v44 }
 0x4e0   : > { %1468 = vst [vmem:[%s2329_s29 + $0xc] sm:$0xf] %v1138_v45  ;;  %s1884_s29 = scalar_lea.vmem %s2422_s21, 128 }
 0x4e1   : > { %p1885_p10 = scmp.ne.s32.totalorder %s2422_s21, %s1884_s29  ;;  %p1892_p5 = scmp.lt.s32.totalorder %s1890_s23, %s1884_s29 }
 0x4e3   : > { %p1886_p4 = pnand %p1885_p10, %p2569_p6  ;;  %p1893_p2 = por %p1892_p5, %p1891_p11 }
 0x4e5   : > { %p1887_p9 = pneg %p1886_p4 }
 0x4e6   : > { %v1687_v46 = vpop.eup %1686 }
 0x4e7   : > { %v1065_v47 = vmul.f32 %v1687_v46, %v1058_v37  ;;  %p1894_p7 = pnand %p1893_p2, %p1887_p9 }
 0x4e9   : > { %v1066_v48 = vmax.f32 %v1065_v47, 0.0 }
 0x4eb   : > { %v1067_v49 = vsel %vm2348_vm3, %v1066_v48, 0.0 }
 0x4ec   : > { %1068 = vst [vmem:[#allocation3] sm:$0xff] %v1067_v49  ;;  %1069 = vst [vmem:[%s530_s30] sm:$0xff] %v1067_v49 }
 0x4ed   : > { %1897 = shalt.err (!%p1894_p7)
}
 0x4ee   : > { %s1898_s14 = scalar_lea.hbm %s2420_s17, 128  ;;  %s1902_s20 = scalar_lea.hbm %s2570_s16, 384 }
 0x4ef   : > { %p1899_p0 = scmp.ne.s32.totalorder %s2420_s17, %s1898_s14  ;;  %p1903_p13 = scmp.lt.s32.totalorder %s2420_s17, %s2570_s16 }
 0x4f0   : > { %p1904_p8 = scmp.lt.s32.totalorder %s1902_s20, %s1898_s14 }
 0x4f1   : > { %p1900_p1 = pnand %p1899_p0, %p2569_p6 }
 0x4f2   : > { %p1905_p3 = por %p1904_p8, %p1903_p13 }
 0x4f3   : > { %p1901_p12 = pneg %p1900_p1 }
 0x4f5   : > { %p1906_p10 = pnand %p1905_p3, %p1901_p12 }
 0x4f7   : > { %1909 = shalt.err (!%p1906_p10)
}
 0x4f8   : > { %1543 = dma.vmem_to_hbm [thread:$0]  (%p2569_p6), %s2422_s21, 128, %s2420_s17, %s1147_s27  }
 0x4f9   : > { %s1910_s15 = scalar_lea.vmem %s2429_s11, 256  ;;  %s2019_s5 = smov [#allocation21]  }
 0x4fa   : > { %p1911_p4 = scmp.ne.s32.totalorder %s2429_s11, %s1910_s15  ;;  %s1914_s26 = sshll.u32 %s2019_s5, 4  ;;  %s1915_s26 = int_to_ptr.vmem [resolvable:$false] %s1914_s26 }
 0x4fb   : > { %s1916_s29 = scalar_lea.vmem %s1915_s26, 512  ;;  %p1917_p5 = scmp.lt.s32.totalorder %s2429_s11, %s1915_s26 }
 0x4fc   : > { %p1912_p9 = pnand %p1911_p4, %p2569_p6  ;;  %p1918_p2 = scmp.lt.s32.totalorder %s1916_s29, %s1910_s15 }
 0x4fe   : > { %p1913_p11 = pneg %p1912_p9  ;;  %p1919_p7 = por %p1918_p2, %p1917_p5 }
 0x500   : > { %p1920_p0 = pnand %p1919_p7, %p1913_p11 }
 0x502   : > { %1923 = shalt.err (!%p1920_p0)
}
 0x503   : > { %s1924_s10 = scalar_lea.hbm %s2427_s18, 256  ;;  %s1928_s22 = scalar_lea.hbm %s2571_s1, 768 }
 0x504   : > { %p1925_p1 = scmp.ne.s32.totalorder %s2427_s18, %s1924_s10  ;;  %p1929_p8 = scmp.lt.s32.totalorder %s2427_s18, %s2571_s1 }
 0x505   : > { %p1930_p3 = scmp.lt.s32.totalorder %s1928_s22, %s1924_s10 }
 0x506   : > { %p1926_p12 = pnand %p1925_p1, %p2569_p6 }
 0x507   : > { %p1931_p10 = por %p1930_p3, %p1929_p8 }
 0x508   : > { %p1927_p13 = pneg %p1926_p12 }
 0x50a   : > { %p1932_p4 = pnand %p1931_p10, %p1927_p13 }
 0x50c   : > { %1935 = shalt.err (!%p1932_p4)
}
 0x50d   : > { %s2020_s30 = smov 64   ;;  %s2021_s24 = smov 4  }
 0x50e   : > { %1544 = dma.vmem_to_hbm [thread:$0]  (%p2569_p6), %s2429_s11, 256, %s2427_s18, %s1147_s27, %s2020_s30, %s2020_s30, %s2021_s24  }
 0x50f PF: > { %s2572_s20 = sld [smem:[#allocation30_spill]]  ;;  %p1585_p9 = scmp.ge.s32.totalorder %s1996_s0, 2 }
 0x510   : > { %s2573_s2 = sld [smem:[#allocation32_spill]] }
 0x515   : > { %s1206_s12 = sand.u32 1, %s2572_s20  }
 0x516   : > { %p2574_p11 = scmp.ne.s32.totalorder %s2573_s2, 0  ;;  %s1207_s15 = scalar_lea.sflag [#allocation9], %s1206_s12 }
 0x518   : > { %p1569_p5 = pnand %p1585_p9, %p2574_p11 }
 0x51a   : > { %p1570_p2 = pneg %p1569_p5 }
 0x51c   : > { %1975 = dma.done.wait (%p1570_p2), %s1207_s15, 128  }
 0x51d   : > { %1977 = vsyncadd (%p1570_p2), %s1207_s15, 4294967168  ;;  %s2575_s5 = sadd.s32 4294967294, %s1996_s0  }
 0x51e   : > { %s1215_s26 = sand.u32 1, %s2575_s5  }
 0x51f   : > { %s1216_s29 = scalar_lea.sflag [#allocation20], %s1215_s26 }
 0x520   : > { %1979 = dma.done.wait (%p1570_p2), %s1216_s29, 384  }
 0x521   : > { %1981 = vsyncadd (%p1570_p2), %s1216_s29, 4294966912  ;;  %s2576_s0 = sld [smem:[#allocation33_spill]]  ;;  %s2579_s24 = smov %s1988_s25 }
 0x522   : > { %s2577_s28 = sld [smem:[#allocation31_spill]] }
 0x523   : > { %s2578_s26 = sld [smem:[#allocation34_spill]] }
 0x527   : > { %p38_p6 = scmp.ge.s32.totalorder %s2576_s0, 5  }
 0x528   : > { %s2580_s25 = smov %s2577_s28 }
 0x529   :  { %40 = sbr.rel (!%p38_p6) target bundleno = 22 (0x16), region = 181 }
 0x52e   :  { %1230 = vsyncpa [#allocation8], 1 }
 0x52f   :  { %1232 = vsyncpa [#allocation8 + $0x1], 1 }
 0x530   :  { %1233 = vsyncpa [#allocation11], 1 }
 0x531   :  { %1235 = vsyncpa [#allocation11 + $0x1], 1 }
 0x532   :  { %1236 = vsyncpa [#allocation14], 1 }
 0x533   :  { %1238 = vsyncpa [#allocation14 + $0x1], 1 }
 0x534   :  { %1239 = vsyncpa [#allocation17], 1 }
 0x535   :  { %1240 = vsyncpa [#allocation9], 1 }
 0x536   :  { %1242 = vsyncpa [#allocation9 + $0x1], 1 }
 0x537   :  { %1243 = vsyncpa [#allocation20], 1 }
 0x538   :  { %1245 = vsyncpa [#allocation20 + $0x1], 1 }

</bundles_post_ra>
